<compile_context>
chip_gen: v6e
topology: v6e:2x2x1
jax: 0.10.0
libtpu: 0.0.40
codegen_flags: <defaults>
</compile_context>

<pallas_src>
import functools
import math

import jax
import jax.numpy as jnp
from jax import lax
from jax.experimental import pallas as pl
from jax.experimental.pallas import tpu as pltpu


# ----------------------------- small math helpers -----------------------------
_SQRT_2_OVER_PI = 0.7978845608028654


def _gelu_tanh(x):
    # tanh-approximate GELU: transcendental rides the EUP slot.
    return 0.5 * x * (1.0 + jnp.tanh(_SQRT_2_OVER_PI * (x + 0.044715 * x * x * x)))


def _layer_norm(x, gamma, beta, eps=1e-5):
    mu = jnp.mean(x, axis=-1, keepdims=True)
    var = jnp.mean((x - mu) ** 2, axis=-1, keepdims=True)
    return (x - mu) * lax.rsqrt(var + eps) * gamma + beta


# ----------------------------- fused Pallas kernel -----------------------------
def fused_ebm_kernel(n_heads,
                     x_ref, kbias_ref,
                     ln1_g_ref, ln1_b_ref,
                     wq_ref, bq_ref, wk_ref, bk_ref, wv_ref, bv_ref,
                     wo_ref, bo_ref,
                     ln2_g_ref, ln2_b_ref,
                     w1_ref, b1_ref, w2_ref, b2_ref,
                     hg_ref, hb_ref, hw1_ref, hb1_ref, hw2_ref, hb2_ref,
                     out_ref,
                     xacc_ref, q_ref, k_ref, v_ref, ctx_ref):
    layer = pl.program_id(1)
    n_layers = pl.num_programs(1)

    L, D = xacc_ref.shape
    hd = D // n_heads
    scale = 1.0 / math.sqrt(hd)

    # First layer of this batch element: load activations into the VMEM-resident
    # residual-stream accumulator (stays resident across the layer grid axis).
    @pl.when(layer == 0)
    def _():
        xacc_ref[...] = x_ref[0]

    x = xacc_ref[...]                                    # (L, D) f32 residual stream
    kbias = kbias_ref[0]                                 # (1, L) additive mask bias

    # ------------------- self-attention sub-block (norm_first) -----------------
    xn = _layer_norm(x, ln1_g_ref[0], ln1_b_ref[0]).astype(jnp.bfloat16)
    q = jnp.dot(xn, wq_ref[0], preferred_element_type=jnp.float32) + bq_ref[0]
    k = jnp.dot(xn, wk_ref[0], preferred_element_type=jnp.float32) + bk_ref[0]
    v = jnp.dot(xn, wv_ref[0], preferred_element_type=jnp.float32) + bv_ref[0]
    q_ref[...] = (q * scale).astype(jnp.bfloat16)        # pre-scaled queries
    k_ref[...] = k.astype(jnp.bfloat16)
    v_ref[...] = v.astype(jnp.bfloat16)

    # Per-head score/context; heads sliced from the scratch *refs* (bounds live
    # ranges), per-head context concatenated along lanes into ctx_ref.
    for h in range(n_heads):                             # small static unroll
        sl = slice(h * hd, (h + 1) * hd)
        s = lax.dot_general(q_ref[:, sl], k_ref[:, sl],
                            (((1,), (1,)), ((), ())),
                            preferred_element_type=jnp.float32)   # (L, L)
        s = s + kbias                                    # mask padded keys
        s = s - jnp.max(s, axis=-1, keepdims=True)
        p = jnp.exp(s)
        p = p * pl.reciprocal(jnp.sum(p, axis=-1, keepdims=True), approx=True)
        o_h = jnp.dot(p.astype(jnp.bfloat16), v_ref[:, sl],
                      preferred_element_type=jnp.float32)          # (L, hd)
        ctx_ref[:, sl] = o_h.astype(jnp.bfloat16)

    # Single full-width output projection after concatenating the heads.
    attn = jnp.dot(ctx_ref[...], wo_ref[0],
                   preferred_element_type=jnp.float32) + bo_ref[0]
    x = x + attn

    # ----------------------------- feed-forward --------------------------------
    xn2 = _layer_norm(x, ln2_g_ref[0], ln2_b_ref[0]).astype(jnp.bfloat16)
    hid = _gelu_tanh(jnp.dot(xn2, w1_ref[0],
                             preferred_element_type=jnp.float32) + b1_ref[0])
    ff = jnp.dot(hid.astype(jnp.bfloat16), w2_ref[0],
                 preferred_element_type=jnp.float32) + b2_ref[0]
    x = x + ff
    xacc_ref[...] = x                                    # carry to next layer

    # ------------------ energy head on the CLS row (last layer) ----------------
    @pl.when(layer == n_layers - 1)
    def _():
        cls = x[0:1, :]                                  # (1, D)
        clsn = _layer_norm(cls, hg_ref[...], hb_ref[...]).astype(jnp.bfloat16)
        hh = _gelu_tanh(jnp.dot(clsn, hw1_ref[...],
                                preferred_element_type=jnp.float32) + hb1_ref[...])
        # Linear(D, 1) stored as a (1, D) row -> lane reduction, not an N=1 matmul.
        e = jnp.sum(hh * hw2_ref[...], axis=-1, keepdims=True) + hb2_ref[...]
        out_ref[0] = e.astype(out_ref.dtype)


# ----------------------------- wrapper ------------------------------------------
def _layer_block_spec(p):
    # Stacked (n_layers, ...) weight: block is one layer's slab, indexed by the
    # layer grid coordinate -> default double-buffering prefetches layer l+1.
    n_rest = p.ndim - 1
    return pl.BlockSpec((1,) + p.shape[1:],
                        lambda b, l, _n=n_rest: (l,) + (0,) * _n)


def _const_block_spec(p):
    return pl.BlockSpec(p.shape, lambda b, l, _n=p.ndim: (0,) * _n)


def trans_ebm_forward(params, ids, mask, n_heads):
    emb = params["emb"]
    d_model = emb.shape[1]
    x = (emb[ids] * (d_model ** 0.5)).astype(jnp.float32)           # (B, L, D) glue
    B, L, D = x.shape
    kbias = jnp.where(mask == 0, -1e30, 0.0).astype(jnp.float32)[:, None, :]  # (B,1,L)

    n_layers = len(params["layers"])
    # Stack per-layer weights along a leading layer axis; cast matmul weights to
    # bf16 (halves weight DMA / VMEM; MXU runs bf16 x bf16 with f32 accumulate).
    bf16_idx = {2, 4, 6, 8, 12, 14}                      # wq, wk, wv, wo, ffn_w1, ffn_w2
    stacked = []
    for i in range(16):
        p = jnp.stack([lp[i] for lp in params["layers"]], axis=0)
        stacked.append(p.astype(jnp.bfloat16) if i in bf16_idx else p)

    head = list(params["head"])
    head[2] = head[2].astype(jnp.bfloat16)               # head Linear(D, D) weight

    in_specs = [pl.BlockSpec((1, L, D), lambda b, l: (b, 0, 0)),
                pl.BlockSpec((1, 1, L), lambda b, l: (b, 0, 0))]
    in_specs += [_layer_block_spec(p) for p in stacked]
    in_specs += [_const_block_spec(p) for p in head]

    kernel = functools.partial(fused_ebm_kernel, n_heads)

    out = pl.pallas_call(
        kernel,
        out_shape=jax.ShapeDtypeStruct((B, 1, 1), jnp.float32),
        grid=(B, n_layers),
        in_specs=in_specs,
        out_specs=pl.BlockSpec((1, 1, 1), lambda b, l: (b, 0, 0)),
        scratch_shapes=[
            pltpu.VMEM((L, D), jnp.float32),    # resident residual stream
            pltpu.VMEM((L, D), jnp.bfloat16),   # q (pre-scaled)
            pltpu.VMEM((L, D), jnp.bfloat16),   # k
            pltpu.VMEM((L, D), jnp.bfloat16),   # v
            pltpu.VMEM((L, D), jnp.bfloat16),   # concat'd per-head context
        ],
        compiler_params=pltpu.CompilerParams(
            dimension_semantics=("parallel", "arbitrary"),
            vmem_limit_bytes=64 * 1024 * 1024,
        ),
    )(x, kbias, *stacked, *head)
    return out[:, 0, 0]                                   # (B,) energies


# ----------------------------- reference (plain JAX, f32) ------------------------
def reference_forward(params, ids, mask, n_heads):
    d_model = params["emb"].shape[1]
    x = params["emb"][ids] * (d_model ** 0.5)
    B, L, D = x.shape
    hd = D // n_heads
    scale = 1.0 / math.sqrt(hd)
    kbias = jnp.where(mask == 0, -1e30, 0.0).astype(jnp.float32)     # (B, L)
    gelu = lambda t: jax.nn.gelu(t, approximate=False)
    for lp in params["layers"]:
        (g1, be1, wq, bq, wk, bk, wv, bv, wo, bo, g2, be2, w1, bb1, w2, bb2) = lp
        xn = _layer_norm(x, g1, be1)
        q = (xn @ wq + bq).reshape(B, L, n_heads, hd).transpose(0, 2, 1, 3) * scale
        k = (xn @ wk + bk).reshape(B, L, n_heads, hd).transpose(0, 2, 1, 3)
        v = (xn @ wv + bv).reshape(B, L, n_heads, hd).transpose(0, 2, 1, 3)
        s = jnp.einsum("bhqd,bhkd->bhqk", q, k) + kbias[:, None, None, :]
        p = jax.nn.softmax(s, axis=-1)
        a = jnp.einsum("bhqk,bhkd->bhqd", p, v).transpose(0, 2, 1, 3).reshape(B, L, D)
        x = x + a @ wo + bo
        xn2 = _layer_norm(x, g2, be2)
        x = x + gelu(xn2 @ w1 + bb1) @ w2 + bb2
    cls = x[:, 0]
    g, be, w1, b1, w2, b2 = params["head"]
    h = gelu(_layer_norm(cls, g, be) @ w1 + b1)
    return jnp.sum(h * w2, axis=-1) + b2[0, 0]


# ----------------------------- deterministic params ------------------------------
def init_params(key, vocab_size, d_model, n_layers):
    d_ff = 4 * d_model
    keys = iter(jax.random.split(key, 128))

    def nrm(shape, std=0.02):
        return (std * jax.random.normal(next(keys), shape)).astype(jnp.float32)

    params = {"emb": nrm((vocab_size, d_model)), "layers": [], "head": None}
    for _ in range(n_layers):
        params["layers"].append([
            jnp.ones((1, d_model), jnp.float32),          # ln1 gamma
            jnp.zeros((1, d_model), jnp.float32),         # ln1 beta
            nrm((d_model, d_model)), nrm((1, d_model)),   # Wq, bq  (stored as x @ W)
            nrm((d_model, d_model)), nrm((1, d_model)),   # Wk, bk
            nrm((d_model, d_model)), nrm((1, d_model)),   # Wv, bv
            nrm((d_model, d_model)), nrm((1, d_model)),   # Wo, bo
            jnp.ones((1, d_model), jnp.float32),          # ln2 gamma
            jnp.zeros((1, d_model), jnp.float32),         # ln2 beta
            nrm((d_model, d_ff)), nrm((1, d_ff)),         # FFN linear1
            nrm((d_ff, d_model)), nrm((1, d_model)),      # FFN linear2
        ])
    params["head"] = [
        jnp.ones((1, d_model), jnp.float32),              # head LN gamma
        jnp.zeros((1, d_model), jnp.float32),             # head LN beta
        nrm((d_model, d_model)), nrm((1, d_model)),       # Linear(D, D)
        nrm((1, d_model)), nrm((1, 1)),                   # Linear(D, 1) as (1, D) row + bias
    ]
    return params


# ----------------------------- demo ----------------------------------------------
if __name__ == "__main__":
    vocab_size, d_model, n_heads, n_layers = 32, 64, 4, 2
    B, L = 2, 16

    params = init_params(jax.random.PRNGKey(0), vocab_size, d_model, n_layers)

    ids = jax.random.randint(jax.random.PRNGKey(1), (B, L), 0, vocab_size, dtype=jnp.int32)
    mask = jnp.ones((B, L), jnp.int32).at[1, L // 2:].set(0)   # row 1 has padding

    energy = trans_ebm_forward(params, ids, mask, n_heads)
    energy = jax.block_until_ready(energy)

    ref = reference_forward(params, ids, mask, n_heads)

    assert energy.shape == (B,)
    assert bool(jnp.all(jnp.isfinite(energy)))
    # bf16 matmuls + tanh-GELU + approx reciprocal vs exact f32 reference.
    assert bool(jnp.allclose(energy, ref, rtol=5e-2, atol=5e-3)), (energy, ref)
    print("KERNEL_OK")
</pallas_src>

<mosaic_0001>
module attributes {stable_mosaic.version = 11 : i64} {
  func.func @fused_ebm_kernel(%arg0: i32, %arg1: i32, %arg2: memref<1x16x64xf32, #tpu.memory_space<vmem>>, %arg3: memref<1x1x16xf32, #tpu.memory_space<vmem>>, %arg4: memref<1x1x64xf32, #tpu.memory_space<vmem>>, %arg5: memref<1x1x64xf32, #tpu.memory_space<vmem>>, %arg6: memref<1x64x64xbf16, #tpu.memory_space<vmem>>, %arg7: memref<1x1x64xf32, #tpu.memory_space<vmem>>, %arg8: memref<1x64x64xbf16, #tpu.memory_space<vmem>>, %arg9: memref<1x1x64xf32, #tpu.memory_space<vmem>>, %arg10: memref<1x64x64xbf16, #tpu.memory_space<vmem>>, %arg11: memref<1x1x64xf32, #tpu.memory_space<vmem>>, %arg12: memref<1x64x64xbf16, #tpu.memory_space<vmem>>, %arg13: memref<1x1x64xf32, #tpu.memory_space<vmem>>, %arg14: memref<1x1x64xf32, #tpu.memory_space<vmem>>, %arg15: memref<1x1x64xf32, #tpu.memory_space<vmem>>, %arg16: memref<1x64x256xbf16, #tpu.memory_space<vmem>>, %arg17: memref<1x1x256xf32, #tpu.memory_space<vmem>>, %arg18: memref<1x256x64xbf16, #tpu.memory_space<vmem>>, %arg19: memref<1x1x64xf32, #tpu.memory_space<vmem>>, %arg20: memref<1x64xf32, #tpu.memory_space<vmem>>, %arg21: memref<1x64xf32, #tpu.memory_space<vmem>>, %arg22: memref<64x64xbf16, #tpu.memory_space<vmem>>, %arg23: memref<1x64xf32, #tpu.memory_space<vmem>>, %arg24: memref<1x64xf32, #tpu.memory_space<vmem>>, %arg25: memref<1x1xf32, #tpu.memory_space<vmem>>, %arg26: memref<1x1x1xf32, #tpu.memory_space<vmem>>, %arg27: memref<16x64xf32, #tpu.memory_space<vmem>>, %arg28: memref<16x64xbf16, #tpu.memory_space<vmem>>, %arg29: memref<16x64xbf16, #tpu.memory_space<vmem>>, %arg30: memref<16x64xbf16, #tpu.memory_space<vmem>>, %arg31: memref<16x64xbf16, #tpu.memory_space<vmem>>) attributes {dimension_semantics = [#tpu.dimension_semantics<parallel>, #tpu.dimension_semantics<arbitrary>], iteration_bounds = array<i64: 2, 2>, scalar_prefetch = 0 : i64, scratch_operands = 5 : i64, tpu.core_type = #tpu.core_type<tc>, window_params = [{transform_indices = @transform_0, window_bounds = array<i64: 1, 16, 64>}, {transform_indices = @transform_1, window_bounds = array<i64: 1, 1, 16>}, {transform_indices = @transform_2, window_bounds = array<i64: 1, 1, 64>}, {transform_indices = @transform_3, window_bounds = array<i64: 1, 1, 64>}, {transform_indices = @transform_4, window_bounds = array<i64: 1, 64, 64>}, {transform_indices = @transform_5, window_bounds = array<i64: 1, 1, 64>}, {transform_indices = @transform_6, window_bounds = array<i64: 1, 64, 64>}, {transform_indices = @transform_7, window_bounds = array<i64: 1, 1, 64>}, {transform_indices = @transform_8, window_bounds = array<i64: 1, 64, 64>}, {transform_indices = @transform_9, window_bounds = array<i64: 1, 1, 64>}, {transform_indices = @transform_10, window_bounds = array<i64: 1, 64, 64>}, {transform_indices = @transform_11, window_bounds = array<i64: 1, 1, 64>}, {transform_indices = @transform_12, window_bounds = array<i64: 1, 1, 64>}, {transform_indices = @transform_13, window_bounds = array<i64: 1, 1, 64>}, {transform_indices = @transform_14, window_bounds = array<i64: 1, 64, 256>}, {transform_indices = @transform_15, window_bounds = array<i64: 1, 1, 256>}, {transform_indices = @transform_16, window_bounds = array<i64: 1, 256, 64>}, {transform_indices = @transform_17, window_bounds = array<i64: 1, 1, 64>}, {pipeline_mode = #tpu.pipeline_mode<synchronous>, transform_indices = @transform_18, window_bounds = array<i64: 1, 64>}, {pipeline_mode = #tpu.pipeline_mode<synchronous>, transform_indices = @transform_19, window_bounds = array<i64: 1, 64>}, {pipeline_mode = #tpu.pipeline_mode<synchronous>, transform_indices = @transform_20, window_bounds = array<i64: 64, 64>}, {pipeline_mode = #tpu.pipeline_mode<synchronous>, transform_indices = @transform_21, window_bounds = array<i64: 1, 64>}, {pipeline_mode = #tpu.pipeline_mode<synchronous>, transform_indices = @transform_22, window_bounds = array<i64: 1, 64>}, {pipeline_mode = #tpu.pipeline_mode<synchronous>, transform_indices = @transform_23, window_bounds = array<i64: 1, 1>}, {transform_indices = @transform_24, window_bounds = array<i64: 1, 1, 1>}]} {
    %c0_i32 = arith.constant 0 : i32
    %0 = arith.cmpi eq, %arg1, %c0_i32 : i32
    %1 = arith.extui %0 : i1 to i32
    %c0_i32_0 = arith.constant 0 : i32
    %2 = arith.cmpi ne, %1, %c0_i32_0 : i32
    scf.if %2 {
      %c0_129 = arith.constant 0 : index
      %c0_130 = arith.constant 0 : index
      %c0_131 = arith.constant 0 : index
      %211 = vector.load %arg2[%c0_129, %c0_130, %c0_131] : memref<1x16x64xf32, #tpu.memory_space<vmem>>, vector<1x16x64xf32>
      %212 = vector.shape_cast %211 : vector<1x16x64xf32> to vector<16x64xf32>
      %c0_132 = arith.constant 0 : index
      %c0_133 = arith.constant 0 : index
      %213 = vector.load %arg27[%c0_132, %c0_133] : memref<16x64xf32, #tpu.memory_space<vmem>>, vector<16x64xf32>
      tpu.vector_store %arg27[%c0_132, %c0_133], %212 {strides = array<i32>} : memref<16x64xf32, #tpu.memory_space<vmem>>, vector<16x64xf32>,
    } else {
    }
    %c0 = arith.constant 0 : index
    %c0_1 = arith.constant 0 : index
    %3 = vector.load %arg27[%c0, %c0_1] : memref<16x64xf32, #tpu.memory_space<vmem>>, vector<16x64xf32>
    %c0_2 = arith.constant 0 : index
    %c0_3 = arith.constant 0 : index
    %c0_4 = arith.constant 0 : index
    %4 = vector.load %arg3[%c0_2, %c0_3, %c0_4] : memref<1x1x16xf32, #tpu.memory_space<vmem>>, vector<1x1x16xf32>
    %5 = vector.shape_cast %4 : vector<1x1x16xf32> to vector<1x16xf32>
    %c0_5 = arith.constant 0 : index
    %c0_6 = arith.constant 0 : index
    %c0_7 = arith.constant 0 : index
    %6 = vector.load %arg4[%c0_5, %c0_6, %c0_7] : memref<1x1x64xf32, #tpu.memory_space<vmem>>, vector<1x1x64xf32>
    %7 = vector.shape_cast %6 : vector<1x1x64xf32> to vector<1x64xf32>
    %c0_8 = arith.constant 0 : index
    %c0_9 = arith.constant 0 : index
    %c0_10 = arith.constant 0 : index
    %8 = vector.load %arg5[%c0_8, %c0_9, %c0_10] : memref<1x1x64xf32, #tpu.memory_space<vmem>>, vector<1x1x64xf32>
    %9 = vector.shape_cast %8 : vector<1x1x64xf32> to vector<1x64xf32>
    %cst = arith.constant dense<0.000000e+00> : vector<16xf32>
    %10 = vector.multi_reduction <add>, %3, %cst [1] : vector<16x64xf32> to vector<16xf32>
    %11 = vector.shape_cast %10 : vector<16xf32> to vector<16x1xf32>
    %cst_11 = arith.constant 6.400000e+01 : f32
    %12 = vector.broadcast %cst_11 : f32 to vector<16x1xf32>
    %13 = arith.divf %11, %12 : vector<16x1xf32>
    %14 = vector.broadcast %13 : vector<16x1xf32> to vector<16x64xf32>
    %15 = arith.subf %3, %14 : vector<16x64xf32>
    %16 = arith.mulf %15, %15 : vector<16x64xf32>
    %cst_12 = arith.constant dense<0.000000e+00> : vector<16xf32>
    %17 = vector.multi_reduction <add>, %16, %cst_12 [1] : vector<16x64xf32> to vector<16xf32>
    %18 = vector.shape_cast %17 : vector<16xf32> to vector<16x1xf32>
    %cst_13 = arith.constant 6.400000e+01 : f32
    %19 = vector.broadcast %cst_13 : f32 to vector<16x1xf32>
    %20 = arith.divf %18, %19 : vector<16x1xf32>
    %21 = vector.broadcast %13 : vector<16x1xf32> to vector<16x64xf32>
    %22 = arith.subf %3, %21 : vector<16x64xf32>
    %cst_14 = arith.constant 9.99999974E-6 : f32
    %23 = vector.broadcast %cst_14 : f32 to vector<16x1xf32>
    %24 = arith.addf %20, %23 : vector<16x1xf32>
    %25 = math.rsqrt %24 : vector<16x1xf32>
    %26 = vector.broadcast %25 : vector<16x1xf32> to vector<16x64xf32>
    %27 = arith.mulf %22, %26 : vector<16x64xf32>
    %28 = vector.broadcast %7 : vector<1x64xf32> to vector<16x64xf32>
    %29 = arith.mulf %27, %28 : vector<16x64xf32>
    %30 = vector.broadcast %9 : vector<1x64xf32> to vector<16x64xf32>
    %31 = arith.addf %29, %30 : vector<16x64xf32>
    %32 = arith.truncf %31 : vector<16x64xf32> to vector<16x64xbf16>
    %c0_15 = arith.constant 0 : index
    %c0_16 = arith.constant 0 : index
    %c0_17 = arith.constant 0 : index
    %33 = vector.load %arg6[%c0_15, %c0_16, %c0_17] : memref<1x64x64xbf16, #tpu.memory_space<vmem>>, vector<1x64x64xbf16>
    %34 = vector.shape_cast %33 : vector<1x64x64xbf16> to vector<64x64xbf16>
    %cst_18 = arith.constant dense<0.000000e+00> : vector<16x64xf32>
    %35 = tpu.matmul %32, %34, %cst_18 {dimension_numbers = #tpu.dot_dimension_numbers<[1], [0], [0], [1], [0, 0, 1, 1], [], []>} : vector<16x64xbf16>, vector<64x64xbf16>, vector<16x64xf32> -> vector<16x64xf32>
    %c0_19 = arith.constant 0 : index
    %c0_20 = arith.constant 0 : index
    %c0_21 = arith.constant 0 : index
    %36 = vector.load %arg7[%c0_19, %c0_20, %c0_21] : memref<1x1x64xf32, #tpu.memory_space<vmem>>, vector<1x1x64xf32>
    %37 = vector.shape_cast %36 : vector<1x1x64xf32> to vector<1x64xf32>
    %38 = vector.broadcast %37 : vector<1x64xf32> to vector<16x64xf32>
    %39 = arith.addf %35, %38 : vector<16x64xf32>
    %c0_22 = arith.constant 0 : index
    %c0_23 = arith.constant 0 : index
    %c0_24 = arith.constant 0 : index
    %40 = vector.load %arg8[%c0_22, %c0_23, %c0_24] : memref<1x64x64xbf16, #tpu.memory_space<vmem>>, vector<1x64x64xbf16>
    %41 = vector.shape_cast %40 : vector<1x64x64xbf16> to vector<64x64xbf16>
    %cst_25 = arith.constant dense<0.000000e+00> : vector<16x64xf32>
    %42 = tpu.matmul %32, %41, %cst_25 {dimension_numbers = #tpu.dot_dimension_numbers<[1], [0], [0], [1], [0, 0, 1, 1], [], []>} : vector<16x64xbf16>, vector<64x64xbf16>, vector<16x64xf32> -> vector<16x64xf32>
    %c0_26 = arith.constant 0 : index
    %c0_27 = arith.constant 0 : index
    %c0_28 = arith.constant 0 : index
    %43 = vector.load %arg9[%c0_26, %c0_27, %c0_28] : memref<1x1x64xf32, #tpu.memory_space<vmem>>, vector<1x1x64xf32>
    %44 = vector.shape_cast %43 : vector<1x1x64xf32> to vector<1x64xf32>
    %45 = vector.broadcast %44 : vector<1x64xf32> to vector<16x64xf32>
    %46 = arith.addf %42, %45 : vector<16x64xf32>
    %c0_29 = arith.constant 0 : index
    %c0_30 = arith.constant 0 : index
    %c0_31 = arith.constant 0 : index
    %47 = vector.load %arg10[%c0_29, %c0_30, %c0_31] : memref<1x64x64xbf16, #tpu.memory_space<vmem>>, vector<1x64x64xbf16>
    %48 = vector.shape_cast %47 : vector<1x64x64xbf16> to vector<64x64xbf16>
    %cst_32 = arith.constant dense<0.000000e+00> : vector<16x64xf32>
    %49 = tpu.matmul %32, %48, %cst_32 {dimension_numbers = #tpu.dot_dimension_numbers<[1], [0], [0], [1], [0, 0, 1, 1], [], []>} : vector<16x64xbf16>, vector<64x64xbf16>, vector<16x64xf32> -> vector<16x64xf32>
    %c0_33 = arith.constant 0 : index
    %c0_34 = arith.constant 0 : index
    %c0_35 = arith.constant 0 : index
    %50 = vector.load %arg11[%c0_33, %c0_34, %c0_35] : memref<1x1x64xf32, #tpu.memory_space<vmem>>, vector<1x1x64xf32>
    %51 = vector.shape_cast %50 : vector<1x1x64xf32> to vector<1x64xf32>
    %52 = vector.broadcast %51 : vector<1x64xf32> to vector<16x64xf32>
    %53 = arith.addf %49, %52 : vector<16x64xf32>
    %cst_36 = arith.constant 2.500000e-01 : f32
    %54 = vector.broadcast %cst_36 : f32 to vector<16x64xf32>
    %55 = arith.mulf %39, %54 : vector<16x64xf32>
    %56 = arith.truncf %55 : vector<16x64xf32> to vector<16x64xbf16>
    %c0_37 = arith.constant 0 : index
    %c0_38 = arith.constant 0 : index
    %57 = vector.load %arg28[%c0_37, %c0_38] : memref<16x64xbf16, #tpu.memory_space<vmem>>, vector<16x64xbf16>
    tpu.vector_store %arg28[%c0_37, %c0_38], %56 {strides = array<i32>} : memref<16x64xbf16, #tpu.memory_space<vmem>>, vector<16x64xbf16>,
    %58 = arith.truncf %46 : vector<16x64xf32> to vector<16x64xbf16>
    %c0_39 = arith.constant 0 : index
    %c0_40 = arith.constant 0 : index
    %59 = vector.load %arg29[%c0_39, %c0_40] : memref<16x64xbf16, #tpu.memory_space<vmem>>, vector<16x64xbf16>
    tpu.vector_store %arg29[%c0_39, %c0_40], %58 {strides = array<i32>} : memref<16x64xbf16, #tpu.memory_space<vmem>>, vector<16x64xbf16>,
    %60 = arith.truncf %53 : vector<16x64xf32> to vector<16x64xbf16>
    %c0_41 = arith.constant 0 : index
    %c0_42 = arith.constant 0 : index
    %61 = vector.load %arg30[%c0_41, %c0_42] : memref<16x64xbf16, #tpu.memory_space<vmem>>, vector<16x64xbf16>
    tpu.vector_store %arg30[%c0_41, %c0_42], %60 {strides = array<i32>} : memref<16x64xbf16, #tpu.memory_space<vmem>>, vector<16x64xbf16>,
    %c0_43 = arith.constant 0 : index
    %c0_44 = arith.constant 0 : index
    %62 = vector.load %arg28[%c0_43, %c0_44] : memref<16x64xbf16, #tpu.memory_space<vmem>>, vector<16x16xbf16>
    %c0_45 = arith.constant 0 : index
    %c0_46 = arith.constant 0 : index
    %63 = vector.load %arg29[%c0_45, %c0_46] : memref<16x64xbf16, #tpu.memory_space<vmem>>, vector<16x16xbf16>
    %cst_47 = arith.constant dense<0.000000e+00> : vector<16x16xf32>
    %64 = tpu.matmul %62, %63, %cst_47 {dimension_numbers = #tpu.dot_dimension_numbers<[1], [1], [0], [0], [0, 0, 1, 0], [], []>} : vector<16x16xbf16>, vector<16x16xbf16>, vector<16x16xf32> -> vector<16x16xf32>
    %65 = vector.broadcast %5 : vector<1x16xf32> to vector<16x16xf32>
    %66 = arith.addf %64, %65 : vector<16x16xf32>
    %cst_48 = arith.constant dense<0xFF800000> : vector<16xf32>
    %67 = vector.multi_reduction <maximumf>, %66, %cst_48 [1] : vector<16x16xf32> to vector<16xf32>
    %68 = vector.shape_cast %67 : vector<16xf32> to vector<16x1xf32>
    %69 = vector.broadcast %68 : vector<16x1xf32> to vector<16x16xf32>
    %70 = arith.subf %66, %69 : vector<16x16xf32>
    %71 = math.exp %70 : vector<16x16xf32>
    %cst_49 = arith.constant dense<0.000000e+00> : vector<16xf32>
    %72 = vector.multi_reduction <add>, %71, %cst_49 [1] : vector<16x16xf32> to vector<16xf32>
    %73 = vector.shape_cast %72 : vector<16xf32> to vector<16x1xf32>
    %74 = tpu.reciprocal %73 {approx = true} : vector<16x1xf32> -> vector<16x1xf32>
    %75 = vector.broadcast %74 : vector<16x1xf32> to vector<16x16xf32>
    %76 = arith.mulf %71, %75 : vector<16x16xf32>
    %77 = arith.truncf %76 : vector<16x16xf32> to vector<16x16xbf16>
    %c0_50 = arith.constant 0 : index
    %c0_51 = arith.constant 0 : index
    %78 = vector.load %arg30[%c0_50, %c0_51] : memref<16x64xbf16, #tpu.memory_space<vmem>>, vector<16x16xbf16>
    %cst_52 = arith.constant dense<0.000000e+00> : vector<16x16xf32>
    %79 = tpu.matmul %77, %78, %cst_52 {dimension_numbers = #tpu.dot_dimension_numbers<[1], [0], [0], [1], [0, 0, 1, 1], [], []>} : vector<16x16xbf16>, vector<16x16xbf16>, vector<16x16xf32> -> vector<16x16xf32>
    %80 = arith.truncf %79 : vector<16x16xf32> to vector<16x16xbf16>
    %c0_53 = arith.constant 0 : index
    %c0_54 = arith.constant 0 : index
    %81 = vector.load %arg31[%c0_53, %c0_54] : memref<16x64xbf16, #tpu.memory_space<vmem>>, vector<16x16xbf16>
    tpu.vector_store %arg31[%c0_53, %c0_54], %80 {strides = array<i32>} : memref<16x64xbf16, #tpu.memory_space<vmem>>, vector<16x16xbf16>,
    %c0_55 = arith.constant 0 : index
    %c16 = arith.constant 16 : index
    %82 = vector.load %arg28[%c0_55, %c16] : memref<16x64xbf16, #tpu.memory_space<vmem>>, vector<16x16xbf16>
    %c0_56 = arith.constant 0 : index
    %c16_57 = arith.constant 16 : index
    %83 = vector.load %arg29[%c0_56, %c16_57] : memref<16x64xbf16, #tpu.memory_space<vmem>>, vector<16x16xbf16>
    %cst_58 = arith.constant dense<0.000000e+00> : vector<16x16xf32>
    %84 = tpu.matmul %82, %83, %cst_58 {dimension_numbers = #tpu.dot_dimension_numbers<[1], [1], [0], [0], [0, 0, 1, 0], [], []>} : vector<16x16xbf16>, vector<16x16xbf16>, vector<16x16xf32> -> vector<16x16xf32>
    %85 = vector.broadcast %5 : vector<1x16xf32> to vector<16x16xf32>
    %86 = arith.addf %84, %85 : vector<16x16xf32>
    %cst_59 = arith.constant dense<0xFF800000> : vector<16xf32>
    %87 = vector.multi_reduction <maximumf>, %86, %cst_59 [1] : vector<16x16xf32> to vector<16xf32>
    %88 = vector.shape_cast %87 : vector<16xf32> to vector<16x1xf32>
    %89 = vector.broadcast %88 : vector<16x1xf32> to vector<16x16xf32>
    %90 = arith.subf %86, %89 : vector<16x16xf32>
    %91 = math.exp %90 : vector<16x16xf32>
    %cst_60 = arith.constant dense<0.000000e+00> : vector<16xf32>
    %92 = vector.multi_reduction <add>, %91, %cst_60 [1] : vector<16x16xf32> to vector<16xf32>
    %93 = vector.shape_cast %92 : vector<16xf32> to vector<16x1xf32>
    %94 = tpu.reciprocal %93 {approx = true} : vector<16x1xf32> -> vector<16x1xf32>
    %95 = vector.broadcast %94 : vector<16x1xf32> to vector<16x16xf32>
    %96 = arith.mulf %91, %95 : vector<16x16xf32>
    %97 = arith.truncf %96 : vector<16x16xf32> to vector<16x16xbf16>
    %c0_61 = arith.constant 0 : index
    %c16_62 = arith.constant 16 : index
    %98 = vector.load %arg30[%c0_61, %c16_62] : memref<16x64xbf16, #tpu.memory_space<vmem>>, vector<16x16xbf16>
    %cst_63 = arith.constant dense<0.000000e+00> : vector<16x16xf32>
    %99 = tpu.matmul %97, %98, %cst_63 {dimension_numbers = #tpu.dot_dimension_numbers<[1], [0], [0], [1], [0, 0, 1, 1], [], []>} : vector<16x16xbf16>, vector<16x16xbf16>, vector<16x16xf32> -> vector<16x16xf32>
    %100 = arith.truncf %99 : vector<16x16xf32> to vector<16x16xbf16>
    %c0_64 = arith.constant 0 : index
    %c16_65 = arith.constant 16 : index
    %101 = vector.load %arg31[%c0_64, %c16_65] : memref<16x64xbf16, #tpu.memory_space<vmem>>, vector<16x16xbf16>
    tpu.vector_store %arg31[%c0_64, %c16_65], %100 {strides = array<i32>} : memref<16x64xbf16, #tpu.memory_space<vmem>>, vector<16x16xbf16>,
    %c0_66 = arith.constant 0 : index
    %c32 = arith.constant 32 : index
    %102 = vector.load %arg28[%c0_66, %c32] : memref<16x64xbf16, #tpu.memory_space<vmem>>, vector<16x16xbf16>
    %c0_67 = arith.constant 0 : index
    %c32_68 = arith.constant 32 : index
    %103 = vector.load %arg29[%c0_67, %c32_68] : memref<16x64xbf16, #tpu.memory_space<vmem>>, vector<16x16xbf16>
    %cst_69 = arith.constant dense<0.000000e+00> : vector<16x16xf32>
    %104 = tpu.matmul %102, %103, %cst_69 {dimension_numbers = #tpu.dot_dimension_numbers<[1], [1], [0], [0], [0, 0, 1, 0], [], []>} : vector<16x16xbf16>, vector<16x16xbf16>, vector<16x16xf32> -> vector<16x16xf32>
    %105 = vector.broadcast %5 : vector<1x16xf32> to vector<16x16xf32>
    %106 = arith.addf %104, %105 : vector<16x16xf32>
    %cst_70 = arith.constant dense<0xFF800000> : vector<16xf32>
    %107 = vector.multi_reduction <maximumf>, %106, %cst_70 [1] : vector<16x16xf32> to vector<16xf32>
    %108 = vector.shape_cast %107 : vector<16xf32> to vector<16x1xf32>
    %109 = vector.broadcast %108 : vector<16x1xf32> to vector<16x16xf32>
    %110 = arith.subf %106, %109 : vector<16x16xf32>
    %111 = math.exp %110 : vector<16x16xf32>
    %cst_71 = arith.constant dense<0.000000e+00> : vector<16xf32>
    %112 = vector.multi_reduction <add>, %111, %cst_71 [1] : vector<16x16xf32> to vector<16xf32>
    %113 = vector.shape_cast %112 : vector<16xf32> to vector<16x1xf32>
    %114 = tpu.reciprocal %113 {approx = true} : vector<16x1xf32> -> vector<16x1xf32>
    %115 = vector.broadcast %114 : vector<16x1xf32> to vector<16x16xf32>
    %116 = arith.mulf %111, %115 : vector<16x16xf32>
    %117 = arith.truncf %116 : vector<16x16xf32> to vector<16x16xbf16>
    %c0_72 = arith.constant 0 : index
    %c32_73 = arith.constant 32 : index
    %118 = vector.load %arg30[%c0_72, %c32_73] : memref<16x64xbf16, #tpu.memory_space<vmem>>, vector<16x16xbf16>
    %cst_74 = arith.constant dense<0.000000e+00> : vector<16x16xf32>
    %119 = tpu.matmul %117, %118, %cst_74 {dimension_numbers = #tpu.dot_dimension_numbers<[1], [0], [0], [1], [0, 0, 1, 1], [], []>} : vector<16x16xbf16>, vector<16x16xbf16>, vector<16x16xf32> -> vector<16x16xf32>
    %120 = arith.truncf %119 : vector<16x16xf32> to vector<16x16xbf16>
    %c0_75 = arith.constant 0 : index
    %c32_76 = arith.constant 32 : index
    %121 = vector.load %arg31[%c0_75, %c32_76] : memref<16x64xbf16, #tpu.memory_space<vmem>>, vector<16x16xbf16>
    tpu.vector_store %arg31[%c0_75, %c32_76], %120 {strides = array<i32>} : memref<16x64xbf16, #tpu.memory_space<vmem>>, vector<16x16xbf16>,
    %c0_77 = arith.constant 0 : index
    %c48 = arith.constant 48 : index
    %122 = vector.load %arg28[%c0_77, %c48] : memref<16x64xbf16, #tpu.memory_space<vmem>>, vector<16x16xbf16>
    %c0_78 = arith.constant 0 : index
    %c48_79 = arith.constant 48 : index
    %123 = vector.load %arg29[%c0_78, %c48_79] : memref<16x64xbf16, #tpu.memory_space<vmem>>, vector<16x16xbf16>
    %cst_80 = arith.constant dense<0.000000e+00> : vector<16x16xf32>
    %124 = tpu.matmul %122, %123, %cst_80 {dimension_numbers = #tpu.dot_dimension_numbers<[1], [1], [0], [0], [0, 0, 1, 0], [], []>} : vector<16x16xbf16>, vector<16x16xbf16>, vector<16x16xf32> -> vector<16x16xf32>
    %125 = vector.broadcast %5 : vector<1x16xf32> to vector<16x16xf32>
    %126 = arith.addf %124, %125 : vector<16x16xf32>
    %cst_81 = arith.constant dense<0xFF800000> : vector<16xf32>
    %127 = vector.multi_reduction <maximumf>, %126, %cst_81 [1] : vector<16x16xf32> to vector<16xf32>
    %128 = vector.shape_cast %127 : vector<16xf32> to vector<16x1xf32>
    %129 = vector.broadcast %128 : vector<16x1xf32> to vector<16x16xf32>
    %130 = arith.subf %126, %129 : vector<16x16xf32>
    %131 = math.exp %130 : vector<16x16xf32>
    %cst_82 = arith.constant dense<0.000000e+00> : vector<16xf32>
    %132 = vector.multi_reduction <add>, %131, %cst_82 [1] : vector<16x16xf32> to vector<16xf32>
    %133 = vector.shape_cast %132 : vector<16xf32> to vector<16x1xf32>
    %134 = tpu.reciprocal %133 {approx = true} : vector<16x1xf32> -> vector<16x1xf32>
    %135 = vector.broadcast %134 : vector<16x1xf32> to vector<16x16xf32>
    %136 = arith.mulf %131, %135 : vector<16x16xf32>
    %137 = arith.truncf %136 : vector<16x16xf32> to vector<16x16xbf16>
    %c0_83 = arith.constant 0 : index
    %c48_84 = arith.constant 48 : index
    %138 = vector.load %arg30[%c0_83, %c48_84] : memref<16x64xbf16, #tpu.memory_space<vmem>>, vector<16x16xbf16>
    %cst_85 = arith.constant dense<0.000000e+00> : vector<16x16xf32>
    %139 = tpu.matmul %137, %138, %cst_85 {dimension_numbers = #tpu.dot_dimension_numbers<[1], [0], [0], [1], [0, 0, 1, 1], [], []>} : vector<16x16xbf16>, vector<16x16xbf16>, vector<16x16xf32> -> vector<16x16xf32>
    %140 = arith.truncf %139 : vector<16x16xf32> to vector<16x16xbf16>
    %c0_86 = arith.constant 0 : index
    %c48_87 = arith.constant 48 : index
    %141 = vector.load %arg31[%c0_86, %c48_87] : memref<16x64xbf16, #tpu.memory_space<vmem>>, vector<16x16xbf16>
    tpu.vector_store %arg31[%c0_86, %c48_87], %140 {strides = array<i32>} : memref<16x64xbf16, #tpu.memory_space<vmem>>, vector<16x16xbf16>,
    %c0_88 = arith.constant 0 : index
    %c0_89 = arith.constant 0 : index
    %142 = vector.load %arg31[%c0_88, %c0_89] : memref<16x64xbf16, #tpu.memory_space<vmem>>, vector<16x64xbf16>
    %c0_90 = arith.constant 0 : index
    %c0_91 = arith.constant 0 : index
    %c0_92 = arith.constant 0 : index
    %143 = vector.load %arg12[%c0_90, %c0_91, %c0_92] : memref<1x64x64xbf16, #tpu.memory_space<vmem>>, vector<1x64x64xbf16>
    %144 = vector.shape_cast %143 : vector<1x64x64xbf16> to vector<64x64xbf16>
    %cst_93 = arith.constant dense<0.000000e+00> : vector<16x64xf32>
    %145 = tpu.matmul %142, %144, %cst_93 {dimension_numbers = #tpu.dot_dimension_numbers<[1], [0], [0], [1], [0, 0, 1, 1], [], []>} : vector<16x64xbf16>, vector<64x64xbf16>, vector<16x64xf32> -> vector<16x64xf32>
    %c0_94 = arith.constant 0 : index
    %c0_95 = arith.constant 0 : index
    %c0_96 = arith.constant 0 : index
    %146 = vector.load %arg13[%c0_94, %c0_95, %c0_96] : memref<1x1x64xf32, #tpu.memory_space<vmem>>, vector<1x1x64xf32>
    %147 = vector.shape_cast %146 : vector<1x1x64xf32> to vector<1x64xf32>
    %148 = vector.broadcast %147 : vector<1x64xf32> to vector<16x64xf32>
    %149 = arith.addf %145, %148 : vector<16x64xf32>
    %150 = arith.addf %3, %149 : vector<16x64xf32>
    %c0_97 = arith.constant 0 : index
    %c0_98 = arith.constant 0 : index
    %c0_99 = arith.constant 0 : index
    %151 = vector.load %arg14[%c0_97, %c0_98, %c0_99] : memref<1x1x64xf32, #tpu.memory_space<vmem>>, vector<1x1x64xf32>
    %152 = vector.shape_cast %151 : vector<1x1x64xf32> to vector<1x64xf32>
    %c0_100 = arith.constant 0 : index
    %c0_101 = arith.constant 0 : index
    %c0_102 = arith.constant 0 : index
    %153 = vector.load %arg15[%c0_100, %c0_101, %c0_102] : memref<1x1x64xf32, #tpu.memory_space<vmem>>, vector<1x1x64xf32>
    %154 = vector.shape_cast %153 : vector<1x1x64xf32> to vector<1x64xf32>
    %cst_103 = arith.constant dense<0.000000e+00> : vector<16xf32>
    %155 = vector.multi_reduction <add>, %150, %cst_103 [1] : vector<16x64xf32> to vector<16xf32>
    %156 = vector.shape_cast %155 : vector<16xf32> to vector<16x1xf32>
    %cst_104 = arith.constant 6.400000e+01 : f32
    %157 = vector.broadcast %cst_104 : f32 to vector<16x1xf32>
    %158 = arith.divf %156, %157 : vector<16x1xf32>
    %159 = vector.broadcast %158 : vector<16x1xf32> to vector<16x64xf32>
    %160 = arith.subf %150, %159 : vector<16x64xf32>
    %161 = arith.mulf %160, %160 : vector<16x64xf32>
    %cst_105 = arith.constant dense<0.000000e+00> : vector<16xf32>
    %162 = vector.multi_reduction <add>, %161, %cst_105 [1] : vector<16x64xf32> to vector<16xf32>
    %163 = vector.shape_cast %162 : vector<16xf32> to vector<16x1xf32>
    %cst_106 = arith.constant 6.400000e+01 : f32
    %164 = vector.broadcast %cst_106 : f32 to vector<16x1xf32>
    %165 = arith.divf %163, %164 : vector<16x1xf32>
    %166 = vector.broadcast %158 : vector<16x1xf32> to vector<16x64xf32>
    %167 = arith.subf %150, %166 : vector<16x64xf32>
    %cst_107 = arith.constant 9.99999974E-6 : f32
    %168 = vector.broadcast %cst_107 : f32 to vector<16x1xf32>
    %169 = arith.addf %165, %168 : vector<16x1xf32>
    %170 = math.rsqrt %169 : vector<16x1xf32>
    %171 = vector.broadcast %170 : vector<16x1xf32> to vector<16x64xf32>
    %172 = arith.mulf %167, %171 : vector<16x64xf32>
    %173 = vector.broadcast %152 : vector<1x64xf32> to vector<16x64xf32>
    %174 = arith.mulf %172, %173 : vector<16x64xf32>
    %175 = vector.broadcast %154 : vector<1x64xf32> to vector<16x64xf32>
    %176 = arith.addf %174, %175 : vector<16x64xf32>
    %177 = arith.truncf %176 : vector<16x64xf32> to vector<16x64xbf16>
    %c0_108 = arith.constant 0 : index
    %c0_109 = arith.constant 0 : index
    %c0_110 = arith.constant 0 : index
    %178 = vector.load %arg16[%c0_108, %c0_109, %c0_110] : memref<1x64x256xbf16, #tpu.memory_space<vmem>>, vector<1x64x256xbf16>
    %179 = vector.shape_cast %178 : vector<1x64x256xbf16> to vector<64x256xbf16>
    %cst_111 = arith.constant dense<0.000000e+00> : vector<16x256xf32>
    %180 = tpu.matmul %177, %179, %cst_111 {dimension_numbers = #tpu.dot_dimension_numbers<[1], [0], [0], [1], [0, 0, 1, 1], [], []>} : vector<16x64xbf16>, vector<64x256xbf16>, vector<16x256xf32> -> vector<16x256xf32>
    %c0_112 = arith.constant 0 : index
    %c0_113 = arith.constant 0 : index
    %c0_114 = arith.constant 0 : index
    %181 = vector.load %arg17[%c0_112, %c0_113, %c0_114] : memref<1x1x256xf32, #tpu.memory_space<vmem>>, vector<1x1x256xf32>
    %182 = vector.shape_cast %181 : vector<1x1x256xf32> to vector<1x256xf32>
    %183 = vector.broadcast %182 : vector<1x256xf32> to vector<16x256xf32>
    %184 = arith.addf %180, %183 : vector<16x256xf32>
    %cst_115 = arith.constant 5.000000e-01 : f32
    %185 = vector.broadcast %cst_115 : f32 to vector<16x256xf32>
    %186 = arith.mulf %185, %184 : vector<16x256xf32>
    %cst_116 = arith.constant 4.471500e-02 : f32
    %187 = vector.broadcast %cst_116 : f32 to vector<16x256xf32>
    %188 = arith.mulf %187, %184 : vector<16x256xf32>
    %189 = arith.mulf %188, %184 : vector<16x256xf32>
    %190 = arith.mulf %189, %184 : vector<16x256xf32>
    %191 = arith.addf %184, %190 : vector<16x256xf32>
    %cst_117 = arith.constant 0.797884583 : f32
    %192 = vector.broadcast %cst_117 : f32 to vector<16x256xf32>
    %193 = arith.mulf %192, %191 : vector<16x256xf32>
    %194 = math.tanh %193 : vector<16x256xf32>
    %cst_118 = arith.constant 1.000000e+00 : f32
    %195 = vector.broadcast %cst_118 : f32 to vector<16x256xf32>
    %196 = arith.addf %195, %194 : vector<16x256xf32>
    %197 = arith.mulf %186, %196 : vector<16x256xf32>
    %198 = arith.truncf %197 : vector<16x256xf32> to vector<16x256xbf16>
    %c0_119 = arith.constant 0 : index
    %c0_120 = arith.constant 0 : index
    %c0_121 = arith.constant 0 : index
    %199 = vector.load %arg18[%c0_119, %c0_120, %c0_121] : memref<1x256x64xbf16, #tpu.memory_space<vmem>>, vector<1x256x64xbf16>
    %200 = vector.shape_cast %199 : vector<1x256x64xbf16> to vector<256x64xbf16>
    %cst_122 = arith.constant dense<0.000000e+00> : vector<16x64xf32>
    %201 = tpu.matmul %198, %200, %cst_122 {dimension_numbers = #tpu.dot_dimension_numbers<[1], [0], [0], [1], [0, 0, 1, 1], [], []>} : vector<16x256xbf16>, vector<256x64xbf16>, vector<16x64xf32> -> vector<16x64xf32>
    %c0_123 = arith.constant 0 : index
    %c0_124 = arith.constant 0 : index
    %c0_125 = arith.constant 0 : index
    %202 = vector.load %arg19[%c0_123, %c0_124, %c0_125] : memref<1x1x64xf32, #tpu.memory_space<vmem>>, vector<1x1x64xf32>
    %203 = vector.shape_cast %202 : vector<1x1x64xf32> to vector<1x64xf32>
    %204 = vector.broadcast %203 : vector<1x64xf32> to vector<16x64xf32>
    %205 = arith.addf %201, %204 : vector<16x64xf32>
    %206 = arith.addf %150, %205 : vector<16x64xf32>
    %c0_126 = arith.constant 0 : index
    %c0_127 = arith.constant 0 : index
    %207 = vector.load %arg27[%c0_126, %c0_127] : memref<16x64xf32, #tpu.memory_space<vmem>>, vector<16x64xf32>
    tpu.vector_store %arg27[%c0_126, %c0_127], %206 {strides = array<i32>} : memref<16x64xf32, #tpu.memory_space<vmem>>, vector<16x64xf32>,
    %c1_i32 = arith.constant 1 : i32
    %208 = arith.cmpi eq, %arg1, %c1_i32 : i32
    %209 = arith.extui %208 : i1 to i32
    %c0_i32_128 = arith.constant 0 : i32
    %210 = arith.cmpi ne, %209, %c0_i32_128 : i32
    scf.if %210 {
      %211 = vector.extract_strided_slice %206 {offsets = [0, 0], sizes = [1, 64], strides = [1, 1]} : vector<16x64xf32> to vector<1x64xf32>
      %c0_129 = arith.constant 0 : index
      %c0_130 = arith.constant 0 : index
      %212 = vector.load %arg20[%c0_129, %c0_130] : memref<1x64xf32, #tpu.memory_space<vmem>>, vector<1x64xf32>
      %c0_131 = arith.constant 0 : index
      %c0_132 = arith.constant 0 : index
      %213 = vector.load %arg21[%c0_131, %c0_132] : memref<1x64xf32, #tpu.memory_space<vmem>>, vector<1x64xf32>
      %cst_133 = arith.constant dense<0.000000e+00> : vector<1xf32>
      %214 = vector.multi_reduction <add>, %211, %cst_133 [1] : vector<1x64xf32> to vector<1xf32>
      %215 = vector.shape_cast %214 : vector<1xf32> to vector<1x1xf32>
      %cst_134 = arith.constant 6.400000e+01 : f32
      %216 = vector.broadcast %cst_134 : f32 to vector<1x1xf32>
      %217 = arith.divf %215, %216 : vector<1x1xf32>
      %218 = vector.broadcast %217 : vector<1x1xf32> to vector<1x64xf32>
      %219 = arith.subf %211, %218 : vector<1x64xf32>
      %220 = arith.mulf %219, %219 : vector<1x64xf32>
      %cst_135 = arith.constant dense<0.000000e+00> : vector<1xf32>
      %221 = vector.multi_reduction <add>, %220, %cst_135 [1] : vector<1x64xf32> to vector<1xf32>
      %222 = vector.shape_cast %221 : vector<1xf32> to vector<1x1xf32>
      %cst_136 = arith.constant 6.400000e+01 : f32
      %223 = vector.broadcast %cst_136 : f32 to vector<1x1xf32>
      %224 = arith.divf %222, %223 : vector<1x1xf32>
      %225 = vector.broadcast %217 : vector<1x1xf32> to vector<1x64xf32>
      %226 = arith.subf %211, %225 : vector<1x64xf32>
      %cst_137 = arith.constant 9.99999974E-6 : f32
      %227 = vector.broadcast %cst_137 : f32 to vector<1x1xf32>
      %228 = arith.addf %224, %227 : vector<1x1xf32>
      %229 = math.rsqrt %228 : vector<1x1xf32>
      %230 = vector.broadcast %229 : vector<1x1xf32> to vector<1x64xf32>
      %231 = arith.mulf %226, %230 : vector<1x64xf32>
      %232 = arith.mulf %231, %212 : vector<1x64xf32>
      %233 = arith.addf %232, %213 : vector<1x64xf32>
      %234 = arith.truncf %233 : vector<1x64xf32> to vector<1x64xbf16>
      %c0_138 = arith.constant 0 : index
      %c0_139 = arith.constant 0 : index
      %235 = vector.load %arg22[%c0_138, %c0_139] : memref<64x64xbf16, #tpu.memory_space<vmem>>, vector<64x64xbf16>
      %cst_140 = arith.constant dense<0.000000e+00> : vector<1x64xf32>
      %236 = tpu.matmul %234, %235, %cst_140 {dimension_numbers = #tpu.dot_dimension_numbers<[1], [0], [0], [1], [0, 0, 1, 1], [], []>} : vector<1x64xbf16>, vector<64x64xbf16>, vector<1x64xf32> -> vector<1x64xf32>
      %c0_141 = arith.constant 0 : index
      %c0_142 = arith.constant 0 : index
      %237 = vector.load %arg23[%c0_141, %c0_142] : memref<1x64xf32, #tpu.memory_space<vmem>>, vector<1x64xf32>
      %238 = arith.addf %236, %237 : vector<1x64xf32>
      %cst_143 = arith.constant 5.000000e-01 : f32
      %239 = vector.broadcast %cst_143 : f32 to vector<1x64xf32>
      %240 = arith.mulf %239, %238 : vector<1x64xf32>
      %cst_144 = arith.constant 4.471500e-02 : f32
      %241 = vector.broadcast %cst_144 : f32 to vector<1x64xf32>
      %242 = arith.mulf %241, %238 : vector<1x64xf32>
      %243 = arith.mulf %242, %238 : vector<1x64xf32>
      %244 = arith.mulf %243, %238 : vector<1x64xf32>
      %245 = arith.addf %238, %244 : vector<1x64xf32>
      %cst_145 = arith.constant 0.797884583 : f32
      %246 = vector.broadcast %cst_145 : f32 to vector<1x64xf32>
      %247 = arith.mulf %246, %245 : vector<1x64xf32>
      %248 = math.tanh %247 : vector<1x64xf32>
      %cst_146 = arith.constant 1.000000e+00 : f32
      %249 = vector.broadcast %cst_146 : f32 to vector<1x64xf32>
      %250 = arith.addf %249, %248 : vector<1x64xf32>
      %251 = arith.mulf %240, %250 : vector<1x64xf32>
      %c0_147 = arith.constant 0 : index
      %c0_148 = arith.constant 0 : index
      %252 = vector.load %arg24[%c0_147, %c0_148] : memref<1x64xf32, #tpu.memory_space<vmem>>, vector<1x64xf32>
      %253 = arith.mulf %251, %252 : vector<1x64xf32>
      %cst_149 = arith.constant dense<0.000000e+00> : vector<1xf32>
      %254 = vector.multi_reduction <add>, %253, %cst_149 [1] : vector<1x64xf32> to vector<1xf32>
      %255 = vector.shape_cast %254 : vector<1xf32> to vector<1x1xf32>
      %c0_150 = arith.constant 0 : index
      %c0_151 = arith.constant 0 : index
      %256 = vector.load %arg25[%c0_150, %c0_151] : memref<1x1xf32, #tpu.memory_space<vmem>>, vector<1x1xf32>
      %257 = arith.addf %255, %256 : vector<1x1xf32>
      %c0_152 = arith.constant 0 : index
      %c0_153 = arith.constant 0 : index
      %c0_154 = arith.constant 0 : index
      %258 = vector.load %arg26[%c0_152, %c0_153, %c0_154] : memref<1x1x1xf32, #tpu.memory_space<vmem>>, vector<1x1x1xf32>
      %259 = vector.shape_cast %258 : vector<1x1x1xf32> to vector<1x1xf32>
      %260 = vector.shape_cast %257 : vector<1x1xf32> to vector<1x1x1xf32>
      tpu.vector_store %arg26[%c0_152, %c0_153, %c0_154], %260 {strides = array<i32>} : memref<1x1x1xf32, #tpu.memory_space<vmem>>, vector<1x1x1xf32>,
    } else {
    }
    return
  }
  func.func @transform_0(%arg0: i32, %arg1: i32) -> (i32, i32, i32) {
    %c0_i32 = arith.constant 0 : i32
    %c0_i32_0 = arith.constant 0 : i32
    %c0_i32_1 = arith.constant 0 : i32
    return %arg0, %c0_i32, %c0_i32_0 : i32, i32, i32
  }
  func.func @transform_1(%arg0: i32, %arg1: i32) -> (i32, i32, i32) {
    %c0_i32 = arith.constant 0 : i32
    %c0_i32_0 = arith.constant 0 : i32
    %c0_i32_1 = arith.constant 0 : i32
    return %arg0, %c0_i32, %c0_i32_0 : i32, i32, i32
  }
  func.func @transform_2(%arg0: i32, %arg1: i32) -> (i32, i32, i32) {
    %c0_i32 = arith.constant 0 : i32
    %c0_i32_0 = arith.constant 0 : i32
    %c0_i32_1 = arith.constant 0 : i32
    return %arg1, %c0_i32, %c0_i32_0 : i32, i32, i32
  }
  func.func @transform_3(%arg0: i32, %arg1: i32) -> (i32, i32, i32) {
    %c0_i32 = arith.constant 0 : i32
    %c0_i32_0 = arith.constant 0 : i32
    %c0_i32_1 = arith.constant 0 : i32
    return %arg1, %c0_i32, %c0_i32_0 : i32, i32, i32
  }
  func.func @transform_4(%arg0: i32, %arg1: i32) -> (i32, i32, i32) {
    %c0_i32 = arith.constant 0 : i32
    %c0_i32_0 = arith.constant 0 : i32
    %c0_i32_1 = arith.constant 0 : i32
    return %arg1, %c0_i32, %c0_i32_0 : i32, i32, i32
  }
  func.func @transform_5(%arg0: i32, %arg1: i32) -> (i32, i32, i32) {
    %c0_i32 = arith.constant 0 : i32
    %c0_i32_0 = arith.constant 0 : i32
    %c0_i32_1 = arith.constant 0 : i32
    return %arg1, %c0_i32, %c0_i32_0 : i32, i32, i32
  }
  func.func @transform_6(%arg0: i32, %arg1: i32) -> (i32, i32, i32) {
    %c0_i32 = arith.constant 0 : i32
    %c0_i32_0 = arith.constant 0 : i32
    %c0_i32_1 = arith.constant 0 : i32
    return %arg1, %c0_i32, %c0_i32_0 : i32, i32, i32
  }
  func.func @transform_7(%arg0: i32, %arg1: i32) -> (i32, i32, i32) {
    %c0_i32 = arith.constant 0 : i32
    %c0_i32_0 = arith.constant 0 : i32
    %c0_i32_1 = arith.constant 0 : i32
    return %arg1, %c0_i32, %c0_i32_0 : i32, i32, i32
  }
  func.func @transform_8(%arg0: i32, %arg1: i32) -> (i32, i32, i32) {
    %c0_i32 = arith.constant 0 : i32
    %c0_i32_0 = arith.constant 0 : i32
    %c0_i32_1 = arith.constant 0 : i32
    return %arg1, %c0_i32, %c0_i32_0 : i32, i32, i32
  }
  func.func @transform_9(%arg0: i32, %arg1: i32) -> (i32, i32, i32) {
    %c0_i32 = arith.constant 0 : i32
    %c0_i32_0 = arith.constant 0 : i32
    %c0_i32_1 = arith.constant 0 : i32
    return %arg1, %c0_i32, %c0_i32_0 : i32, i32, i32
  }
  func.func @transform_10(%arg0: i32, %arg1: i32) -> (i32, i32, i32) {
    %c0_i32 = arith.constant 0 : i32
    %c0_i32_0 = arith.constant 0 : i32
    %c0_i32_1 = arith.constant 0 : i32
    return %arg1, %c0_i32, %c0_i32_0 : i32, i32, i32
  }
  func.func @transform_11(%arg0: i32, %arg1: i32) -> (i32, i32, i32) {
    %c0_i32 = arith.constant 0 : i32
    %c0_i32_0 = arith.constant 0 : i32
    %c0_i32_1 = arith.constant 0 : i32
    return %arg1, %c0_i32, %c0_i32_0 : i32, i32, i32
  }
  func.func @transform_12(%arg0: i32, %arg1: i32) -> (i32, i32, i32) {
    %c0_i32 = arith.constant 0 : i32
    %c0_i32_0 = arith.constant 0 : i32
    %c0_i32_1 = arith.constant 0 : i32
    return %arg1, %c0_i32, %c0_i32_0 : i32, i32, i32
  }
  func.func @transform_13(%arg0: i32, %arg1: i32) -> (i32, i32, i32) {
    %c0_i32 = arith.constant 0 : i32
    %c0_i32_0 = arith.constant 0 : i32
    %c0_i32_1 = arith.constant 0 : i32
    return %arg1, %c0_i32, %c0_i32_0 : i32, i32, i32
  }
  func.func @transform_14(%arg0: i32, %arg1: i32) -> (i32, i32, i32) {
    %c0_i32 = arith.constant 0 : i32
    %c0_i32_0 = arith.constant 0 : i32
    %c0_i32_1 = arith.constant 0 : i32
    return %arg1, %c0_i32, %c0_i32_0 : i32, i32, i32
  }
  func.func @transform_15(%arg0: i32, %arg1: i32) -> (i32, i32, i32) {
    %c0_i32 = arith.constant 0 : i32
    %c0_i32_0 = arith.constant 0 : i32
    %c0_i32_1 = arith.constant 0 : i32
    return %arg1, %c0_i32, %c0_i32_0 : i32, i32, i32
  }
  func.func @transform_16(%arg0: i32, %arg1: i32) -> (i32, i32, i32) {
    %c0_i32 = arith.constant 0 : i32
    %c0_i32_0 = arith.constant 0 : i32
    %c0_i32_1 = arith.constant 0 : i32
    return %arg1, %c0_i32, %c0_i32_0 : i32, i32, i32
  }
  func.func @transform_17(%arg0: i32, %arg1: i32) -> (i32, i32, i32) {
    %c0_i32 = arith.constant 0 : i32
    %c0_i32_0 = arith.constant 0 : i32
    %c0_i32_1 = arith.constant 0 : i32
    return %arg1, %c0_i32, %c0_i32_0 : i32, i32, i32
  }
  func.func @transform_18(%arg0: i32, %arg1: i32) -> (i32, i32) {
    %c0_i32 = arith.constant 0 : i32
    %c0_i32_0 = arith.constant 0 : i32
    %c0_i32_1 = arith.constant 0 : i32
    return %c0_i32, %c0_i32_0 : i32, i32
  }
  func.func @transform_19(%arg0: i32, %arg1: i32) -> (i32, i32) {
    %c0_i32 = arith.constant 0 : i32
    %c0_i32_0 = arith.constant 0 : i32
    %c0_i32_1 = arith.constant 0 : i32
    return %c0_i32, %c0_i32_0 : i32, i32
  }
  func.func @transform_20(%arg0: i32, %arg1: i32) -> (i32, i32) {
    %c0_i32 = arith.constant 0 : i32
    %c0_i32_0 = arith.constant 0 : i32
    %c0_i32_1 = arith.constant 0 : i32
    return %c0_i32, %c0_i32_0 : i32, i32
  }
  func.func @transform_21(%arg0: i32, %arg1: i32) -> (i32, i32) {
    %c0_i32 = arith.constant 0 : i32
    %c0_i32_0 = arith.constant 0 : i32
    %c0_i32_1 = arith.constant 0 : i32
    return %c0_i32, %c0_i32_0 : i32, i32
  }
  func.func @transform_22(%arg0: i32, %arg1: i32) -> (i32, i32) {
    %c0_i32 = arith.constant 0 : i32
    %c0_i32_0 = arith.constant 0 : i32
    %c0_i32_1 = arith.constant 0 : i32
    return %c0_i32, %c0_i32_0 : i32, i32
  }
  func.func @transform_23(%arg0: i32, %arg1: i32) -> (i32, i32) {
    %c0_i32 = arith.constant 0 : i32
    %c0_i32_0 = arith.constant 0 : i32
    %c0_i32_1 = arith.constant 0 : i32
    return %c0_i32, %c0_i32_0 : i32, i32
  }
  func.func @transform_24(%arg0: i32, %arg1: i32) -> (i32, i32, i32) {
    %c0_i32 = arith.constant 0 : i32
    %c0_i32_0 = arith.constant 0 : i32
    %c0_i32_1 = arith.constant 0 : i32
    return %arg0, %c0_i32, %c0_i32_0 : i32, i32, i32
  }
}

</mosaic_0001>

<bundles_post_ra>
// kernel: tpu_custom_call.1
= control target key start
LH: loop header
LB: loop body
LE: loop exit
PB: predicated region body
PF: predicated region fallthrough
CT: control target
= control target key end

     0   :  { %s5097_s0 = inlined_call_operand.hbm [shape: f32[2,16,64], index: 0, kind: input, shape index: {}]   ;;  %s5098_s1 = inlined_call_operand.hbm [shape: f32[2,1,16], index: 1, kind: input, shape index: {}]   ;;  %s5099_s2 = inlined_call_operand.hbm [shape: f32[2,1,64], index: 2, kind: input, shape index: {}]   ;;  %s5100_s3 = inlined_call_operand.hbm [shape: f32[2,1,64], index: 3, kind: input, shape index: {}]   ;;  %s5101_s4 = inlined_call_operand.vmem [shape: bf16[2,64,64], index: 4, kind: input, shape index: {}]   ;;  %s5102_s5 = inlined_call_operand.hbm [shape: f32[2,1,64], index: 5, kind: input, shape index: {}]   ;;  %s5103_s6 = inlined_call_operand.vmem [shape: bf16[2,64,64], index: 6, kind: input, shape index: {}]   ;;  %s5104_s7 = inlined_call_operand.hbm [shape: f32[2,1,64], index: 7, kind: input, shape index: {}]   ;;  %s5105_s8 = inlined_call_operand.vmem [shape: bf16[2,64,64], index: 8, kind: input, shape index: {}]   ;;  %s5106_s9 = inlined_call_operand.hbm [shape: f32[2,1,64], index: 9, kind: input, shape index: {}]   ;;  %s5107_s10 = inlined_call_operand.vmem [shape: bf16[2,64,64], index: 10, kind: input, shape index: {}]   ;;  %s5108_s11 = inlined_call_operand.hbm [shape: f32[2,1,64], index: 11, kind: input, shape index: {}]   ;;  %s5109_s12 = inlined_call_operand.hbm [shape: f32[2,1,64], index: 12, kind: input, shape index: {}]   ;;  %s5110_s13 = inlined_call_operand.hbm [shape: f32[2,1,64], index: 13, kind: input, shape index: {}]   ;;  %s5111_s14 = inlined_call_operand.vmem [shape: bf16[2,64,256], index: 14, kind: input, shape index: {}]   ;;  %s5112_s15 = inlined_call_operand.hbm [shape: f32[2,1,256], index: 15, kind: input, shape index: {}]   ;;  %s5113_s16 = inlined_call_operand.vmem [shape: bf16[2,256,64], index: 16, kind: input, shape index: {}]   ;;  %s5114_s17 = inlined_call_operand.hbm [shape: f32[2,1,64], index: 17, kind: input, shape index: {}]   ;;  %s5115_s18 = inlined_call_operand.vmem [shape: f32[1,64], index: 18, kind: input, shape index: {}]   ;;  %s5116_s19 = inlined_call_operand.hbm [shape: f32[1,64], index: 19, kind: input, shape index: {}]   ;;  %s5117_s20 = inlined_call_operand.vmem [shape: bf16[64,64], index: 20, kind: input, shape index: {}]   ;;  %s5118_s21 = inlined_call_operand.vmem [shape: f32[1,64], index: 21, kind: input, shape index: {}]   ;;  %s5119_s22 = inlined_call_operand.vmem [shape: f32[1,64], index: 22, kind: input, shape index: {}]   ;;  %s5120_s23 = inlined_call_operand.<no memory space> [shape: f32[1,1], index: 23, kind: input, shape index: {}]   ;;  %s5121_s24 = inlined_call_operand.vmem [shape: f32[2,1,1], index: 24, kind: output, shape index: {}]  }
   0x1   :  { %5150 = sst [smem:[#allocation52_spill]] %s5097_s0  ;;  %v29_v0 = vstv %s5120_s23 }
   0x2   :  { %5151 = sst [smem:[#allocation53_spill]] %s5098_s1  ;;  %30 = vst [vmem:[#allocation7] sm:$0x1] %v29_v0 }
   0x3   :  { %5152 = sst [smem:[#allocation54_spill]] %s5099_s2 }
   0x4   :  { %5153 = sst [smem:[#allocation55_spill]] %s5100_s3 }
   0x5   :  { %5154 = sst [smem:[#allocation56_spill]] %s5101_s4 }
   0x6   :  { %5155 = sst [smem:[#allocation57_spill]] %s5102_s5 }
   0x7   :  { %5156 = sst [smem:[#allocation58_spill]] %s5103_s6 }
   0x8   :  { %5157 = sst [smem:[#allocation59_spill]] %s5104_s7 }
   0x9   :  { %5158 = sst [smem:[#allocation60_spill]] %s5105_s8 }
   0xa   :  { %5159 = sst [smem:[#allocation61_spill]] %s5106_s9 }
   0xb   :  { %5160 = sst [smem:[#allocation62_spill]] %s5107_s10 }
   0xc   :  { %5161 = sst [smem:[#allocation63_spill]] %s5108_s11 }
   0xd   :  { %5162 = sst [smem:[#allocation64_spill]] %s5109_s12 }
   0xe   :  { %5163 = sst [smem:[#allocation65_spill]] %s5110_s13 }
   0xf   :  { %5164 = sst [smem:[#allocation66_spill]] %s5111_s14 }
  0x10   :  { %5165 = sst [smem:[#allocation67_spill]] %s5112_s15 }
  0x11   :  { %5166 = sst [smem:[#allocation68_spill]] %s5113_s16 }
  0x12   :  { %5167 = sst [smem:[#allocation69_spill]] %s5114_s17 }
  0x13   :  { %5168 = sst [smem:[#allocation70_spill]] %s5115_s18 }
  0x14   :  { %5169 = sst [smem:[#allocation71_spill]] %s5116_s19 }
  0x15   :  { %5170 = sst [smem:[#allocation72_spill]] %s5117_s20 }
  0x16   :  { %5171 = sst [smem:[#allocation73_spill]] %s5118_s21 }
  0x17   :  { %5172 = sst [smem:[#allocation74_spill]] %s5119_s22 }
  0x18   :  { %5173 = sst [smem:[#allocation75_spill]] %s5121_s24 }
  0x19   :  { %31 = vsyncpa [#allocation9], 0 }
  0x1a   :  { %33 = vsyncpa [#allocation9 + $0x1], 0 }
  0x1b   :  { %34 = vsyncpa [#allocation11], 0 }
  0x1c   :  { %36 = vsyncpa [#allocation11 + $0x1], 0 }
  0x1d   :  { %37 = vsyncpa [#allocation14], 0 }
  0x1e   :  { %39 = vsyncpa [#allocation14 + $0x1], 0 }
  0x1f   :  { %40 = vsyncpa [#allocation17], 0 }
  0x20   :  { %42 = vsyncpa [#allocation17 + $0x1], 0 }
  0x21   :  { %43 = vsyncpa [#allocation20], 0 }
  0x22   :  { %45 = vsyncpa [#allocation20 + $0x1], 0 }
  0x23   :  { %46 = vsyncpa [#allocation23], 0 }
  0x24   :  { %48 = vsyncpa [#allocation23 + $0x1], 0 }
  0x25   :  { %49 = vsyncpa [#allocation26], 0 }
  0x26   :  { %51 = vsyncpa [#allocation26 + $0x1], 0  ;;  %s4417_s27 = smov 0   ;;  %s4419_s28 = smov 0  }
  0x27   :  { %s4421_s23 = smov 0   ;;  %s4423_s6 = smov 0  }
  0x28   :  { %s4425_s2 = smov 0   ;;  %s4427_s29 = smov 0  }
  0x29   :  { %s4429_s0 = smov 0   ;;  %s4431_s7 = smov 0  }
  0x2a   :  { %s4433_s30 = smov 0   ;;  %s4435_s3 = smov 0  }
  0x2b   :  { %s4437_s25 = smov 0  }
  0x2c LB: > { %5174 = sst [smem:[#allocation37_spill]] %s4225_s28  ;;  %s5123_s8 = sadd.s32 4294967295, %s4261_s25   ;;  %s4261_s25 = sphi %s4437_s25, %s57_s25   ;;  %s4257_s3 = sphi %s4435_s3, %s5263_s3   ;;  %s4253_s30 = sphi %s4433_s30, %s5265_s30   ;;  %s4249_s7 = sphi %s4431_s7, %s5261_s7   ;;  %s4245_s0 = sphi %s4429_s0, %s5264_s0   ;;  %s4241_s29 = sphi %s4427_s29, %s5260_s29   ;;  %s4237_s2 = sphi %s4425_s2, %s5259_s2   ;;  %s4233_s6 = sphi %s4423_s6, %s5258_s6   ;;  %s4229_s23 = sphi %s4421_s23, %s5257_s23   ;;  %s4225_s28 = sphi %s4419_s28, %s5256_s28   ;;  %s4221_s27 = sphi %s4417_s27, %s5255_s27  }
  0x2d   : > { %5175 = sst [smem:[#allocation38_spill]] %s4229_s23  ;;  %p89_p0 = scmp.ne.s32.totalorder %s4237_s2, %s4233_s6 }
  0x2e   : > { %5176 = sst [smem:[#allocation39_spill]] %s4237_s2  ;;  %p4472_p1 = scmp.eq.s32.totalorder %s5123_s8, 0 }
  0x2f   : > { %5177 = sst [smem:[#allocation40_spill]] %s4241_s29  ;;  %p141_p3 = scmp.ne.s32.totalorder %s4225_s28, %s4221_s27 }
  0x30   : > { %5178 = sst [smem:[#allocation41_spill]] %s4245_s0  ;;  %p4482_p4 = por %p4472_p1, %p89_p0 }
  0x31   : > { %5179 = sst [smem:[#allocation42_spill]] %s4249_s7  ;;  %p3163_p5 = scmp.ge.s32.totalorder %s4261_s25, 1 }
  0x32   : > { %5180 = sst [smem:[#allocation43_spill]] %s4257_s3  ;;  %p4489_p6 = por %p141_p3, %p4472_p1 }
  0x33   : > { %5181 = sst [smem:[#allocation44_spill]] %s4261_s25  ;;  %p694_p7 = scmp.lt.s32.totalorder %s4261_s25, 5 }
  0x34   : > { %s5182_s4 = scalar_select %p4472_p1, 1, 0 }
  0x35   : > { %s5184_s5 = scalar_select %p4482_p4, 1, 0 }
  0x36   : > { %5183 = sst [smem:[#allocation45_spill]] %s5182_s4  ;;  %p4494_p8 = pnand %p3163_p5, %p694_p7 }
  0x37   : > { %5185 = sst [smem:[#allocation46_spill]] %s5184_s5  ;;  %s4263_s8 = smov [#allocation27]  }
  0x38   : > { %s5186_s26 = scalar_select %p4489_p6, 1, 0 }
  0x39   : > { %s710_s1 = sshll.u32 %s4263_s8, 4  ;;  %p3518_p9 = pneg %p4494_p8  ;;  %s711_s1 = int_to_ptr.vmem [resolvable:$true] %s710_s1 }
  0x3a   : > { %5187 = sst [smem:[#allocation47_spill]] %s5186_s26  ;;  %s4501_s27 = sand.u32 1, %s4229_s23  }
  0x3b   : > { %p3519_p10 = pnand %p3518_p9, %p4472_p1  ;;  %s3788_s22 = scalar_lea.vmem %s711_s1, 16 }
  0x3c   : > { %p3789_p12 = scmp.ne.s32.totalorder %s711_s1, %s3788_s22  ;;  %s3795_s21 = scalar_lea.vmem %s711_s1, 32 }
  0x3d   : > { %p3779_p11 = pneg %p3519_p10  ;;  %p3796_p3 = scmp.lt.s32.totalorder %s711_s1, %s711_s1 }
  0x3e   : > { %p3797_p5 = scmp.lt.s32.totalorder %s3795_s21, %s3788_s22 }
  0x3f   : > { %p3791_p13 = pnand %p3789_p12, %p3779_p11 }
  0x40   : > { %p3798_p7 = por %p3797_p5, %p3796_p3 }
  0x41   : > { %p3792_p0 = pneg %p3791_p13 }
  0x43   : > { %p3799_p2 = pnand %p3798_p7, %p3792_p0 }
  0x45   : > { %3802 = shalt.err (!%p3799_p2)
}
  0x46   : > { %s5189_s19 = sld [smem:[#allocation71_spill]]  ;;  %s66_s21 = sadd.s32 1, %s4253_s30 }
  0x47   : > { %s69_s22 = sadd.s32 1, %s4257_s3  ;;  %p67_p2 = scmp.ge.s32.totalorder %s66_s21, 2 }
  0x48   : > { %s76_s18 = sadd.s32 1, %s4241_s29  ;;  %p83_p9 = scmp.ne.s32.totalorder %s4241_s29, %s4237_s2 }
  0x49   : > { %p84_p11 = scmp.eq.s32.totalorder %s4261_s25, 0  ;;  %s5267_s21 = smov (%p67_p2, %s66_s21), 0 }
  0x4a   : > { %5190 = sst [smem:[#allocation48_spill]] %s5267_s21  ;;  %s5269_s22 = smov (!%p67_p2, %s69_s22), %s4257_s3 }
  0x4b   : > { %p85_p12 = por %p84_p11, %p83_p9  ;;  %p5191_p0 = scmp.ne.s32.totalorder %s4229_s23, %s4225_s28 }
  0x4c   : > { %3521 = dma.hbm_to_vmem [thread:$0]  (!%p3519_p10), %s5189_s19, 16, %s711_s1, [#allocation26]  }
  0x4d   : > { %s125_s1 = ssub.s32 %s4253_s30, %s5267_s21  ;;  %p71_p10 = scmp.ge.s32.totalorder %s5269_s22, 2 }
  0x4e   : > { %p126_p13 = scmp.eq.s32.totalorder %s125_s1, 0  ;;  %p4522_p3 = por %p5191_p0, %p84_p11 }
  0x4f   : > { %p5133_p5 = scmp.lt.s32.totalorder %s4261_s25, 4  ;;  %s5271_s22 = smov (%p71_p10, %s5269_s22), 0 }
  0x50   : > { %5193 = sst [smem:[#allocation49_spill]] %s5271_s22  ;;  %s5194_s19 = sadd.s32 1, %s4229_s23 }
  0x51   : > { %s4532_s20 = scalar_select %p126_p13, %s4229_s23, %s5194_s19  }
  0x52   : > { %s73_s24 = ssub.s32 %s4257_s3, %s5271_s22  ;;  %s4537_s16 = sand.u32 1, %s4241_s29  }
  0x53   : > { %5195 = sst [smem:[#allocation50_spill]] %s4532_s20  ;;  %p74_p7 = scmp.eq.s32.totalorder %s73_s24, 0 }
  0x54   : > { %p4542_p2 = pnand %p5133_p5, %p85_p12  ;;  %s4550_s10 = sand.u32 1, %s4261_s25  }
  0x55   : > { %s4547_s14 = scalar_select %p74_p7, %s4241_s29, %s76_s18  }
  0x56   : > { %s3169_s19 = sshll.u32 %s4257_s3, 4  ;;  %s757_s22 = scalar_lea.vmem [#allocation10], %s4537_s16 }
  0x57   : > { %5197 = sst [smem:[#allocation51_spill]] %s4547_s14  ;;  %s764_s20 = sshll.u32 %s757_s22, 4  ;;  %s765_s20 = int_to_ptr.vmem [resolvable:$true] %s764_s20 }
  0x58   : > { %s5198_s0 = sld [smem:[#allocation53_spill]]  ;;  %s5134_s21 = scalar_lea.sflag [#allocation11], %s4550_s10 }
  0x59   : > { %p5135_p9 = pneg %p4542_p2  ;;  %s3816_s4 = scalar_lea.vmem %s765_s20, 16 }
  0x5a   : > { %p3817_p11 = scmp.ne.s32.totalorder %s765_s20, %s3816_s4  ;;  %s4264_s18 = smov [#allocation10]  }
  0x5b   : > { %s3821_s14 = sshll.u32 %s4264_s18, 4  ;;  %s3822_s14 = int_to_ptr.vmem [resolvable:$false] %s3821_s14 }
  0x5c   : > { %p3819_p12 = pnand %p3817_p11, %p5135_p9  ;;  %s3823_s29 = scalar_lea.vmem %s3822_s14, 32 }
  0x5d   : > { %p3824_p13 = scmp.lt.s32.totalorder %s765_s20, %s3822_s14  ;;  %p3825_p0 = scmp.lt.s32.totalorder %s3823_s29, %s3816_s4 }
  0x5e   : > { %s762_s24 = scalar_lea.hbm %s5198_s0, %s3169_s19  ;;  %p3820_p10 = pneg %p3819_p12 }
  0x5f   : > { %p3826_p7 = por %p3825_p0, %p3824_p13 }
  0x61   : > { %p3827_p5 = pnand %p3826_p7, %p3820_p10 }
  0x63   : > { %3830 = shalt.err (!%p3827_p5)
}
  0x64   : > { %3528 = dma.hbm_to_vmem [thread:$0]  (!%p4542_p2), %s762_s24, 16, %s765_s20, %s5134_s21  }
  0x65   : > { %p5199_p11 = scmp.lt.s32.totalorder %s4261_s25, 4  ;;  %s4576_s14 = sshll.u32 %s4253_s30, 4 }
  0x66   : > { %s5201_s7 = sld [smem:[#allocation55_spill]]  ;;  %s791_s22 = scalar_lea.vmem [#allocation13], %s4501_s27 }
  0x67   : > { %p4571_p12 = pnand %p5199_p11, %p4522_p3  ;;  %s798_s19 = sshll.u32 %s791_s22, 4  ;;  %s799_s19 = int_to_ptr.vmem [resolvable:$true] %s798_s19 }
  0x68   : > { %s5144_s18 = scalar_lea.sflag [#allocation14], %s4550_s10  ;;  %s3844_s8 = scalar_lea.vmem %s799_s19, 16 }
  0x69   : > { %p4586_p5 = pneg %p4571_p12  ;;  %p3845_p3 = scmp.ne.s32.totalorder %s799_s19, %s3844_s8 }
  0x6a   : > { %s4265_s24 = smov [#allocation13]  }
  0x6b   : > { %p3847_p10 = pnand %p3845_p3, %p4586_p5  ;;  %s3849_s21 = sshll.u32 %s4265_s24, 4  ;;  %s3850_s21 = int_to_ptr.vmem [resolvable:$false] %s3849_s21 }
  0x6c   : > { %s796_s4 = scalar_lea.hbm %s5201_s7, %s4576_s14  ;;  %s3851_s29 = scalar_lea.vmem %s3850_s21, 32 }
  0x6d   : > { %p3848_p13 = pneg %p3847_p10  ;;  %p3852_p0 = scmp.lt.s32.totalorder %s799_s19, %s3850_s21 }
  0x6e   : > { %p3853_p7 = scmp.lt.s32.totalorder %s3851_s29, %s3844_s8 }
  0x70   : > { %p3854_p11 = por %p3853_p7, %p3852_p0 }
  0x72   : > { %p3855_p9 = pnand %p3854_p11, %p3848_p13 }
  0x74   : > { %3858 = shalt.err (!%p3855_p9)
}
  0x75   : > { %3534 = dma.hbm_to_vmem [thread:$0]  (!%p4571_p12), %s796_s4, 16, %s799_s19, %s5144_s18  }
  0x76   : > { %s5203_s22 = sld [smem:[#allocation59_spill]]  ;;  %s841_s26 = scalar_lea.vmem [#allocation16], %s4501_s27 }
  0x77   : > { %s848_s28 = sshll.u32 %s841_s26, 4  ;;  %s5142_s21 = scalar_lea.sflag [#allocation17], %s4550_s10  ;;  %s849_s28 = int_to_ptr.vmem [resolvable:$true] %s848_s28 }
  0x78   : > { %s3872_s8 = scalar_lea.vmem %s849_s28, 16  ;;  %s4266_s29 = smov [#allocation16]  }
  0x79   : > { %p3873_p3 = scmp.ne.s32.totalorder %s849_s28, %s3872_s8  ;;  %s3877_s25 = sshll.u32 %s4266_s29, 4  ;;  %s3878_s25 = int_to_ptr.vmem [resolvable:$false] %s3877_s25 }
  0x7a   : > { %s3879_s5 = scalar_lea.vmem %s3878_s25, 32  ;;  %p3880_p13 = scmp.lt.s32.totalorder %s849_s28, %s3878_s25 }
  0x7b   : > { %p3875_p9 = pnand %p3873_p3, %p4586_p5  ;;  %p3881_p0 = scmp.lt.s32.totalorder %s3879_s5, %s3872_s8 }
  0x7c   : > { %s846_s24 = scalar_lea.hbm %s5203_s22, %s4576_s14 }
  0x7d   : > { %p3876_p10 = pneg %p3875_p9  ;;  %p3882_p7 = por %p3881_p0, %p3880_p13 }
  0x7f   : > { %p3883_p11 = pnand %p3882_p7, %p3876_p10 }
  0x81   : > { %3886 = shalt.err (!%p3883_p11)
}
  0x82   : > { %3540 = dma.hbm_to_vmem [thread:$0]  (!%p4571_p12), %s846_s24, 16, %s849_s28, %s5142_s21  }
  0x83   : > { %s5204_s11 = sld [smem:[#allocation63_spill]]  ;;  %s891_s0 = scalar_lea.vmem [#allocation19], %s4501_s27 }
  0x84   : > { %s898_s7 = sshll.u32 %s891_s0, 4  ;;  %s5143_s25 = scalar_lea.sflag [#allocation20], %s4550_s10  ;;  %s899_s7 = int_to_ptr.vmem [resolvable:$true] %s898_s7 }
  0x85   : > { %s3900_s5 = scalar_lea.vmem %s899_s7, 16  ;;  %s4267_s22 = smov [#allocation19]  }
  0x86   : > { %p3901_p3 = scmp.ne.s32.totalorder %s899_s7, %s3900_s5  ;;  %s3905_s8 = sshll.u32 %s4267_s22, 4  ;;  %s3906_s8 = int_to_ptr.vmem [resolvable:$false] %s3905_s8 }
  0x87   : > { %s3907_s29 = scalar_lea.vmem %s3906_s8, 32  ;;  %p3908_p13 = scmp.lt.s32.totalorder %s899_s7, %s3906_s8 }
  0x88   : > { %p3903_p9 = pnand %p3901_p3, %p4586_p5  ;;  %p3909_p0 = scmp.lt.s32.totalorder %s3907_s29, %s3900_s5 }
  0x89   : > { %s896_s19 = scalar_lea.hbm %s5204_s11, %s4576_s14 }
  0x8a   : > { %p3904_p10 = pneg %p3903_p9  ;;  %p3910_p7 = por %p3909_p0, %p3908_p13 }
  0x8c   : > { %p3911_p11 = pnand %p3910_p7, %p3904_p10 }
  0x8e   : > { %3914 = shalt.err (!%p3911_p11)
}
  0x8f   : > { %3546 = dma.hbm_to_vmem [thread:$0]  (!%p4571_p12), %s896_s19, 16, %s899_s7, %s5143_s25  }
  0x90   : > { %s5205_s13 = sld [smem:[#allocation65_spill]]  ;;  %s925_s4 = scalar_lea.vmem [#allocation22], %s4501_s27 }
  0x91   : > { %s932_s0 = sshll.u32 %s925_s4, 4  ;;  %s5147_s5 = scalar_lea.sflag [#allocation23], %s4550_s10  ;;  %s933_s0 = int_to_ptr.vmem [resolvable:$true] %s932_s0 }
  0x92   : > { %s3928_s22 = scalar_lea.vmem %s933_s0, 16  ;;  %s4268_s8 = smov [#allocation22]  }
  0x93   : > { %p3929_p3 = scmp.ne.s32.totalorder %s933_s0, %s3928_s22  ;;  %s3933_s29 = sshll.u32 %s4268_s8, 4  ;;  %s3934_s29 = int_to_ptr.vmem [resolvable:$false] %s3933_s29 }
  0x94   : > { %s3935_s21 = scalar_lea.vmem %s3934_s29, 32  ;;  %p3936_p13 = scmp.lt.s32.totalorder %s933_s0, %s3934_s29 }
  0x95   : > { %p3931_p9 = pnand %p3929_p3, %p4586_p5  ;;  %p3937_p0 = scmp.lt.s32.totalorder %s3935_s21, %s3928_s22 }
  0x96   : > { %s930_s26 = scalar_lea.hbm %s5205_s13, %s4576_s14 }
  0x97   : > { %p3932_p10 = pneg %p3931_p9  ;;  %p3938_p7 = por %p3937_p0, %p3936_p13 }
  0x99   : > { %p3939_p11 = pnand %p3938_p7, %p3932_p10 }
  0x9b   : > { %3942 = shalt.err (!%p3939_p11)
}
  0x9c   : > { %3552 = dma.hbm_to_vmem [thread:$0]  (!%p4571_p12), %s930_s26, 16, %s933_s0, %s5147_s5  }
  0x9d   : > { %s3297_s19 = sshll.u32 %s4257_s3, 8  ;;  %s5206_s7 = sshll.u32 %s4537_s16, 4 }
  0x9e   : > { %s737_s28 = scalar_lea.vmem [#allocation8], %s5206_s7  ;;  %s5207_s29 = sld [smem:[#allocation52_spill]] }
  0x9f   : > { %s744_s24 = sshll.u32 %s737_s28, 4  ;;  %s734_s22 = scalar_lea.sflag [#allocation9], %s4537_s16  ;;  %s745_s24 = int_to_ptr.vmem [resolvable:$true] %s744_s24 }
  0xa0   : > { %s3956_s25 = scalar_lea.vmem %s745_s24, 256  ;;  %p5208_p9 = pneg %p4542_p2 }
  0xa1   : > { %p3957_p3 = scmp.ne.s32.totalorder %s745_s24, %s3956_s25  ;;  %s4269_s18 = smov [#allocation8]  }
  0xa2   : > { %s3961_s11 = sshll.u32 %s4269_s18, 4  ;;  %s3962_s11 = int_to_ptr.vmem [resolvable:$false] %s3961_s11 }
  0xa3   : > { %p3959_p10 = pnand %p3957_p3, %p5208_p9  ;;  %s3963_s26 = scalar_lea.vmem %s3962_s11, 512 }
  0xa4   : > { %s743_s21 = scalar_lea.hbm %s5207_s29, %s3297_s19  ;;  %p3964_p0 = scmp.lt.s32.totalorder %s745_s24, %s3962_s11 }
  0xa5   : > { %p3960_p13 = pneg %p3959_p10  ;;  %p3965_p7 = scmp.lt.s32.totalorder %s3963_s26, %s3956_s25 }
  0xa7   : > { %p3966_p11 = por %p3965_p7, %p3964_p0 }
  0xa9   : > { %p3967_p1 = pnand %p3966_p11, %p3960_p13 }
  0xab   : > { %3970 = shalt.err (!%p3967_p1)
}
  0xac   : > { %s4270_s0 = smov 128   ;;  %s4271_s16 = smov 8  }
  0xad   : > { %3525 = dma.hbm_to_vmem [thread:$0]  (!%p4542_p2), %s743_s21, 256, %s745_s24, %s734_s22, %s4270_s0, %s4270_s0, %s4271_s16  }
  0xae   : > { %s5209_s28 = sld [smem:[#allocation54_spill]]  ;;  %s774_s4 = scalar_lea.vmem [#allocation12], %s4501_s27 }
  0xaf   : > { %s781_s8 = sshll.u32 %s774_s4, 4  ;;  %s5210_s29 = sld [smem:[#allocation57_spill]]  ;;  %s782_s8 = int_to_ptr.vmem [resolvable:$true] %s781_s8 }
  0xb0   : > { %s3984_s13 = scalar_lea.vmem %s782_s8, 16  ;;  %s4272_s3 = smov [#allocation12]  }
  0xb1   : > { %p3985_p1 = scmp.ne.s32.totalorder %s782_s8, %s3984_s13  ;;  %s3989_s2 = sshll.u32 %s4272_s3, 4  ;;  %s3990_s2 = int_to_ptr.vmem [resolvable:$false] %s3989_s2 }
  0xb2   : > { %s3991_s1 = scalar_lea.vmem %s3990_s2, 32  ;;  %p3992_p2 = scmp.lt.s32.totalorder %s782_s8, %s3990_s2 }
  0xb3   : > { %p3987_p3 = pnand %p3985_p1, %p4586_p5  ;;  %p3993_p10 = scmp.lt.s32.totalorder %s3991_s1, %s3984_s13 }
  0xb4   : > { %s779_s18 = scalar_lea.hbm %s5209_s28, %s4576_s14 }
  0xb5   : > { %s821_s5 = scalar_lea.hbm %s5210_s29, %s4576_s14  ;;  %p3988_p9 = pneg %p3987_p3 }
  0xb6   : > { %p3994_p13 = por %p3993_p10, %p3992_p2 }
  0xb8   : > { %p3995_p0 = pnand %p3994_p13, %p3988_p9 }
  0xba   : > { %3998 = shalt.err (!%p3995_p0)
}
  0xbb   : > { %s5212_s24 = scalar_lea.sflag [#allocation11], %s4550_s10  ;;  %s816_s21 = scalar_lea.vmem [#allocation15], %s4501_s27 }
  0xbc   : > { %3531 = dma.hbm_to_vmem [thread:$0]  (!%p4571_p12), %s779_s18, 16, %s782_s8, %s5212_s24  }
  0xbd   : > { %s823_s22 = sshll.u32 %s816_s21, 4  ;;  %s5213_s9 = sld [smem:[#allocation61_spill]]  ;;  %s824_s22 = int_to_ptr.vmem [resolvable:$true] %s823_s22 }
  0xbe   : > { %s4012_s2 = scalar_lea.vmem %s824_s22, 16  ;;  %s4273_s13 = smov [#allocation15]  }
  0xbf   : > { %p4013_p7 = scmp.ne.s32.totalorder %s824_s22, %s4012_s2  ;;  %s4017_s19 = sshll.u32 %s4273_s13, 4  ;;  %s4018_s19 = int_to_ptr.vmem [resolvable:$false] %s4017_s19 }
  0xc0   : > { %s4019_s7 = scalar_lea.vmem %s4018_s19, 32  ;;  %p4020_p3 = scmp.lt.s32.totalorder %s824_s22, %s4018_s19 }
  0xc1   : > { %p4015_p11 = pnand %p4013_p7, %p4586_p5  ;;  %p4021_p9 = scmp.lt.s32.totalorder %s4019_s7, %s4012_s2 }
  0xc3   : > { %s871_s16 = scalar_lea.hbm %s5213_s9, %s4576_s14  ;;  %p4016_p1 = pneg %p4015_p11 }
  0xc4   : > { %p4022_p2 = por %p4021_p9, %p4020_p3 }
  0xc6   : > { %p4023_p10 = pnand %p4022_p2, %p4016_p1 }
  0xc8   : > { %4026 = shalt.err (!%p4023_p10)
}
  0xc9   : > { %s5214_s28 = scalar_lea.sflag [#allocation14], %s4550_s10  ;;  %s866_s8 = scalar_lea.vmem [#allocation18], %s4501_s27 }
  0xca   : > { %3537 = dma.hbm_to_vmem [thread:$0]  (!%p4571_p12), %s821_s5, 16, %s824_s22, %s5214_s28  }
  0xcb   : > { %s873_s11 = sshll.u32 %s866_s8, 4  ;;  %s5215_s12 = sld [smem:[#allocation64_spill]]  ;;  %s874_s11 = int_to_ptr.vmem [resolvable:$true] %s873_s11 }
  0xcc   : > { %s4040_s24 = scalar_lea.vmem %s874_s11, 16  ;;  %s4274_s21 = smov [#allocation18]  }
  0xcd   : > { %p4041_p13 = scmp.ne.s32.totalorder %s874_s11, %s4040_s24  ;;  %s4045_s0 = sshll.u32 %s4274_s21, 4  ;;  %s4046_s0 = int_to_ptr.vmem [resolvable:$false] %s4045_s0 }
  0xce   : > { %s4047_s3 = scalar_lea.vmem %s4046_s0, 32  ;;  %p4048_p11 = scmp.lt.s32.totalorder %s874_s11, %s4046_s0 }
  0xcf   : > { %p4043_p0 = pnand %p4041_p13, %p4586_p5  ;;  %p4049_p1 = scmp.lt.s32.totalorder %s4047_s3, %s4040_s24 }
  0xd1   : > { %s913_s1 = scalar_lea.hbm %s5215_s12, %s4576_s14  ;;  %p4044_p7 = pneg %p4043_p0 }
  0xd2   : > { %p4050_p3 = por %p4049_p1, %p4048_p11 }
  0xd4   : > { %p4051_p9 = pnand %p4050_p3, %p4044_p7 }
  0xd6   : > { %4054 = shalt.err (!%p4051_p9)
}
  0xd7   : > { %s5216_s5 = scalar_lea.sflag [#allocation17], %s4550_s10  ;;  %s908_s13 = scalar_lea.vmem [#allocation21], %s4501_s27 }
  0xd8   : > { %3543 = dma.hbm_to_vmem [thread:$0]  (!%p4571_p12), %s871_s16, 16, %s874_s11, %s5216_s5  }
  0xd9   : > { %s915_s19 = sshll.u32 %s908_s13, 4  ;;  %s3178_s7 = sshll.u32 %s4501_s27, 1  ;;  %s916_s19 = int_to_ptr.vmem [resolvable:$true] %s915_s19 }
  0xda   : > { %s4068_s28 = scalar_lea.vmem %s916_s19, 16  ;;  %s4275_s18 = smov [#allocation21]  }
  0xdb   : > { %p4069_p2 = scmp.ne.s32.totalorder %s916_s19, %s4068_s28  ;;  %s4073_s4 = sshll.u32 %s4275_s18, 4  ;;  %s4074_s4 = int_to_ptr.vmem [resolvable:$false] %s4073_s4 }
  0xdc   : > { %s4075_s8 = scalar_lea.vmem %s4074_s4, 32  ;;  %p4076_p0 = scmp.lt.s32.totalorder %s916_s19, %s4074_s4 }
  0xdd   : > { %p4071_p10 = pnand %p4069_p2, %p4586_p5  ;;  %p4077_p7 = scmp.lt.s32.totalorder %s4075_s8, %s4068_s28 }
  0xdf   : > { %p4072_p13 = pneg %p4071_p10  ;;  %p4078_p11 = por %p4077_p7, %p4076_p0 }
  0xe1   : > { %p4079_p1 = pnand %p4078_p11, %p4072_p13 }
  0xe3   : > { %4082 = shalt.err (!%p4079_p1)
}
  0xe4   : > { %s5217_s16 = scalar_lea.sflag [#allocation20], %s4550_s10  ;;  %s3298_s29 = sshll.u32 %s4253_s30, 5 }
  0xe5   : > { %3549 = dma.hbm_to_vmem [thread:$0]  (!%p4571_p12), %s913_s1, 16, %s916_s19, %s5217_s16  }
  0xe6   : > { %s951_s24 = scalar_lea.vmem [#allocation24], %s3178_s7  ;;  %s5218_s15 = sld [smem:[#allocation67_spill]] }
  0xe7   : > { %s959_s21 = sshll.u32 %s951_s24, 4  ;;  %s4276_s2 = smov [#allocation24]   ;;  %s960_s21 = int_to_ptr.vmem [resolvable:$true] %s959_s21 }
  0xe8   : > { %s4096_s22 = scalar_lea.vmem %s960_s21, 32  ;;  %s4101_s13 = sshll.u32 %s4276_s2, 4  ;;  %s4102_s13 = int_to_ptr.vmem [resolvable:$false] %s4101_s13 }
  0xe9   : > { %p4097_p3 = scmp.ne.s32.totalorder %s960_s21, %s4096_s22  ;;  %s4103_s28 = scalar_lea.vmem %s4102_s13, 64 }
  0xea   : > { %p4104_p10 = scmp.lt.s32.totalorder %s960_s21, %s4102_s13  ;;  %p4105_p13 = scmp.lt.s32.totalorder %s4103_s28, %s4096_s22 }
  0xeb   : > { %p4099_p9 = pnand %p4097_p3, %p4586_p5 }
  0xec   : > { %s957_s5 = scalar_lea.hbm %s5218_s15, %s3298_s29  ;;  %p4106_p0 = por %p4105_p13, %p4104_p10 }
  0xed   : > { %p4100_p2 = pneg %p4099_p9 }
  0xef   : > { %p4107_p7 = pnand %p4106_p0, %p4100_p2 }
  0xf1   : > { %4110 = shalt.err (!%p4107_p7)
}
  0xf2   : > { %s5219_s1 = scalar_lea.sflag [#allocation23], %s4550_s10  ;;  %s5220_s17 = sld [smem:[#allocation69_spill]] }
  0xf3   : > { %3555 = dma.hbm_to_vmem [thread:$0]  (!%p4571_p12), %s957_s5, 32, %s960_s21, %s5219_s1  }
  0xf4   : > { %s977_s4 = scalar_lea.vmem [#allocation25], %s4501_s27  ;;  %s975_s16 = scalar_lea.sflag [#allocation26], %s4550_s10 }
  0xf5   : > { %s984_s8 = sshll.u32 %s977_s4, 4  ;;  %s4277_s25 = smov [#allocation25]   ;;  %s985_s8 = int_to_ptr.vmem [resolvable:$true] %s984_s8 }
  0xf6   : > { %s4124_s11 = scalar_lea.vmem %s985_s8, 16  ;;  %s4129_s29 = sshll.u32 %s4277_s25, 4  ;;  %s4130_s29 = int_to_ptr.vmem [resolvable:$false] %s4129_s29 }
  0xf7   : > { %p4125_p11 = scmp.ne.s32.totalorder %s985_s8, %s4124_s11  ;;  %s4131_s24 = scalar_lea.vmem %s4130_s29, 32 }
  0xf8   : > { %s982_s18 = scalar_lea.hbm %s5220_s17, %s4576_s14  ;;  %p4132_p9 = scmp.lt.s32.totalorder %s985_s8, %s4130_s29 }
  0xf9   : > { %p4127_p1 = pnand %p4125_p11, %p4586_p5  ;;  %p4133_p2 = scmp.lt.s32.totalorder %s4131_s24, %s4124_s11 }
  0xfb   : > { %p4128_p3 = pneg %p4127_p1  ;;  %p4134_p10 = por %p4133_p2, %p4132_p9 }
  0xfd   : > { %p4135_p13 = pnand %p4134_p10, %p4128_p3 }
  0xff   : > { %4138 = shalt.err (!%p4135_p13)
}
 0x100   : > { %3558 = dma.hbm_to_vmem [thread:$0]  (!%p4571_p12), %s982_s18, 16, %s985_s8, %s975_s16  }
 0x101   : > { %993 = sbr.rel (%p4494_p8) target bundleno = 3522 (0xdc2), region = 116  ;;  %s5221_s10 = sld [smem:[#allocation39_spill]] (!%p4494_p8) }
 0x107   : > { %s4727_s14 = sand.u32 1, %s5221_s10  }
 0x108   : > { %s3183_s20 = sshll.u32 %s4727_s14, 4  ;;  %s996_s21 = scalar_lea.sflag [#allocation9], %s4727_s14 }
 0x109   : > { %s4731_s0 = scalar_lea.vmem [#allocation8], %s3183_s20 }
 0x10a   : > { %4184 = dma.done.wait (%p4482_p4), %s996_s21, 256  }
 0x10b   : > { %4186 = vsyncadd (%p4482_p4), %s996_s21, 4294967040  ;;  %s5223_s23 = sld [smem:[#allocation44_spill]] }
 0x111   : > { %s5224_s3 = sadd.s32 4294967295, %s5223_s23  }
 0x112   : > { %s4739_s6 = sand.u32 1, %s5224_s3  }
 0x113   : > { %s1005_s5 = scalar_lea.sflag [#allocation11], %s4739_s6 }
 0x114   : > { %4188 = dma.done.wait (%p4482_p4), %s1005_s5, 16  }
 0x115   : > { %4190 = vsyncadd (%p4482_p4), %s1005_s5, 4294967280  ;;  %s5225_s2 = sld [smem:[#allocation37_spill]] }
 0x11b   : > { %s4748_s28 = sand.u32 1, %s5225_s2  }
 0x11c   : > { %4192 = dma.done.wait (%p4489_p6), %s1005_s5, 16  }
 0x11d   : > { %4194 = vsyncadd (%p4489_p6), %s1005_s5, 4294967280  ;;  %s1021_s19 = scalar_lea.sflag [#allocation14], %s4739_s6 }
 0x11e   : > { %4196 = dma.done.wait (%p4489_p6), %s1021_s19, 32  }
 0x11f   : > { %4198 = vsyncadd (%p4489_p6), %s1021_s19, 4294967264  ;;  %s1037_s4 = scalar_lea.sflag [#allocation17], %s4739_s6 }
 0x120   : > { %4200 = dma.done.wait (%p4489_p6), %s1037_s4, 32  }
 0x121   : > { %4202 = vsyncadd (%p4489_p6), %s1037_s4, 4294967264  ;;  %s1053_s11 = scalar_lea.sflag [#allocation20], %s4739_s6 }
 0x122   : > { %4204 = dma.done.wait (%p4489_p6), %s1053_s11, 32  }
 0x123   : > { %4206 = vsyncadd (%p4489_p6), %s1053_s11, 4294967264  ;;  %s1069_s24 = scalar_lea.sflag [#allocation23], %s4739_s6 }
 0x124   : > { %4208 = dma.done.wait (%p4489_p6), %s1069_s24, 48  }
 0x125   : > { %4210 = vsyncadd (%p4489_p6), %s1069_s24, 4294967248  ;;  %s3184_s27 = sshll.u32 %s4748_s28, 1  ;;  %s1086_s21 = scalar_lea.sflag [#allocation26], %s4739_s6 }
 0x126   : > { %s4783_s20 = scalar_lea.vmem [#allocation24], %s3184_s27 }
 0x127   : > { %4212 = dma.done.wait (%p4489_p6), %s1086_s21, 16  }
 0x128   : > { %4214 = vsyncadd (%p4489_p6), %s1086_s21, 4294967280  ;;  %s5227_s3 = sld [smem:[#allocation45_spill]] }
 0x12e   : > { %p5228_p4 = scmp.ne.s32.totalorder %s5227_s3, 0 }
 0x130   : > { %4216 = dma.done.wait (%p5228_p4), [#allocation26], 16  }
 0x131   : > { %4218 = vsyncadd (%p5228_p4), [#allocation26], 4294967280  ;;  %s5229_s5 = sld [smem:[#allocation41_spill]] }
 0x132   : > { %s5230_s2 = sld [smem:[#allocation42_spill]] }
 0x133   : > { %s5231_s24 = sld [smem:[#allocation56_spill]] }
 0x134   : > { %s5232_s23 = sld [smem:[#allocation58_spill]] }
 0x135   : > { %s5233_s22 = sld [smem:[#allocation60_spill]] }
 0x136   : > { %s5234_s7 = sld [smem:[#allocation62_spill]] }
 0x137   : > { %p1230_p8 = scmp.lt.s32.totalorder %s5229_s5, 1  ;;  %s5235_s13 = sld [smem:[#allocation66_spill]] }
 0x138   : > { %p1260_p12 = scmp.lt.s32.totalorder %s5230_s2, 1  ;;  %p3198_p6 = scmp.ne.s32.totalorder %s5229_s5, 0 }
 0x139   : > { %s1231_s19 = scalar_select %p1230_p8, %s5229_s5, 1 }
 0x13a   : > { %s5273_s2 = smov (!%p1260_p12, %s5230_s2), 1 }
 0x13b   : > { %s3299_s6 = sshll.u32 %s1231_s19, 5  ;;  %s3303_s4 = sshll.u32 %s1231_s19, 6 }
 0x13c   : > { %s4804_s27 = scalar_lea.vmem %s5231_s24, %s3299_s6  ;;  %s4809_s10 = scalar_lea.vmem %s5232_s23, %s3299_s6 }
 0x13d   : > { %s4814_s8 = scalar_lea.vmem %s5233_s22, %s3299_s6  ;;  %s4819_s1 = scalar_lea.vmem %s5234_s7, %s3299_s6 }
 0x13e   : > { %s4824_s11 = scalar_lea.vmem %s5235_s13, %s3303_s4  ;;  %s3304_s24 = sshll.u32 %s1231_s19, 7 }
 0x13f   : > { %s5236_s23 = sld [smem:[#allocation68_spill]] }
 0x140   : > { %s5237_s22 = sld [smem:[#allocation75_spill]] }
 0x142   : > { %1267 = sbr.rel (%p3198_p6) target bundleno = 329 (0x149), region = 172 }
 0x145   : > { %s4829_s3 = scalar_lea.vmem %s5236_s23, %s3304_s24 }
 0x146   : > { %s1262_s29 = scalar_lea.vmem %s5237_s22, %s5273_s2 }
 0x147   : > { %v1268_v1 = vld [vmem:[%s4731_s0] sm:$0xff]  ;;  %vm1270_vm0 = vcmask 523264   ;;  %v1269_v2 = vld [vmem:[%s4731_s0 + $0x8] sm:$0xff] }
 0x148   : > { %1271 = vst.msk [vmem:[#allocation2] sm:$0xff] %vm1270_vm0, %v1268_v1  ;;  %1272 = vst.msk [vmem:[#allocation2 + $0x8] sm:$0xff] %vm1270_vm0, %v1269_v2 }
 0x149 PF: > { %vm1278_vm1 = vcmask 523264   ;;  %v3664_v17 = vld [vmem:[%s4804_s27 + $0x18] sm:$0xff]   ;;  %v4278_v19 = vmov 0.0   ;;  %v3666_v20 = vld [vmem:[%s4804_s27 + $0x10] sm:$0xff]   ;;  %vm4279_vm2 = vmmov 0   ;;  %v3668_v22 = vld [vmem:[%s4804_s27 + $0x8] sm:$0xff]  }
 0x14a   : > { %v3665_v18 = vld [vmem:[%s4814_s8 + $0x18] sm:$0xff]   ;;  %3382 = vmatprep.subr.bf16.mxu1 %v4278_v19  ;;  %3406 = vmatprep.subr.bf16.mxu0 %v4278_v19  ;;  %v3667_v21 = vld [vmem:[%s4814_s8 + $0x10] sm:$0xff]   ;;  %v3669_v23 = vld [vmem:[%s4814_s8 + $0x8] sm:$0xff]   ;;  %s5238_s9 = scalar_lea.vmem [#allocation12], %s4748_s28  ;;  %s5239_s12 = scalar_lea.vmem [#allocation13], %s4748_s28  ;;  %vm1576_vm3 = vcmask 519168  }
 0x14b   : > { %3383 = vmatpush3.bf16.msra.mxu1 %v3664_v17  ;;  %3407 = vmatpush3.bf16.msra.mxu0 %v3665_v18  ;;  %v3670_v24 = vld [vmem:[%s4804_s27] sm:$0xff]   ;;  %v3672_v42 = vld [vmem:[%s4809_s10 + $0x18] sm:$0xff]   ;;  %v3673_v44 = vld [vmem:[%s4809_s10 + $0x10] sm:$0xff]   ;;  %s5240_s15 = scalar_lea.vmem [#allocation15], %s4748_s28  ;;  %s5241_s17 = scalar_lea.vmem [#allocation18], %s4748_s28  ;;  %vm1619_vm4 = vcmask 130048  }
 0x14c   : > { %3384 = vmatprep.subr.bf16.mxu1 %v4278_v19  ;;  %3408 = vmatprep.subr.bf16.mxu0 %v4278_v19  ;;  %v3671_v25 = vld [vmem:[%s4814_s8] sm:$0xff]   ;;  %v3674_v45 = vld [vmem:[%s4809_s10 + $0x8] sm:$0xff]   ;;  %s5242_s0 = scalar_lea.vmem [#allocation16], %s4748_s28  ;;  %s4280_s7 = smov 112   ;;  %vm1750_vm5 = vcmask 125952   ;;  %vm1907_vm6 = vcmask 257152  }
 0x14d   : > { %3390 = vmatprep.mubr.msk.bf16.mxu1 %vm4279_vm2, %v4278_v19  ;;  %3414 = vmatprep.mubr.msk.bf16.mxu0 %vm4279_vm2, %v4278_v19  ;;  %v3199_v34 = vld [vmem:[%s5238_s9] ss:$0 sm:$0xff]  ;;  %s4281_s18 = smov 96   ;;  %s4282_s8 = smov 80   ;;  %vm2064_vm7 = vcmask 388352   ;;  %vm2221_vm8 = vcmask 519552  }
 0x14e   : > { %v3200_v38 = vld [vmem:[%s5239_s12] ss:$0 sm:$0xff]  ;;  %s5243_s16 = scalar_lea.vmem [#allocation10], %s4727_s14  ;;  %s4283_s14 = smov 16  }
 0x14f   : > { %v4838_v3 = vld [vmem:[#allocation2] sm:$0xff]  ;;  %v4840_v4 = vld [vmem:[#allocation2 + $0x8] sm:$0xff]  ;;  %3385 = vmatpush3.bf16.msra.mxu1 %v3666_v20  ;;  %3409 = vmatpush3.bf16.msra.mxu0 %v3667_v21  ;;  %s4285_s5 = smov 48   ;;  %s5245_s19 = scalar_lea.vmem [#allocation21], %s4748_s28 }
 0x150   : > { %v1279_v5 = vsel %vm1278_vm1, %v4838_v3, 0.0  ;;  %v1282_v6 = vsel %vm1278_vm1, %v4840_v4, 0.0  ;;  %3386 = vmatprep.subr.bf16.mxu1 %v4278_v19  ;;  %3410 = vmatprep.subr.bf16.mxu0 %v4278_v19  ;;  %v3675_v46 = vld [vmem:[%s4809_s10] sm:$0xff]   ;;  %s4284_s10 = smov 32   ;;  %s5246_s6 = scalar_lea.vmem [#allocation22], %s4748_s28 }
 0x151   : > { %1280 = vadd.xlane.f32.xlu0 %v1279_v5  ;;  %v3201_v47 = vld [vmem:[%s5240_s15] ss:$0 sm:$0xff]  ;;  %s5248_s4 = sld [smem:[#allocation41_spill]] }
 0x152   : > { %v3213_v48 = vld [vmem:[%s5241_s17] ss:$0 sm:$0xff] }
 0x153   : > { %3387 = vmatpush3.bf16.msra.mxu1 %v3668_v22  ;;  %3411 = vmatpush3.bf16.msra.mxu0 %v3669_v23  ;;  %v3207_v5 = vld [vmem:[%s5242_s0] ss:$0 sm:$0xff] }
 0x154   : > { %3388 = vmatprep.subr.bf16.mxu1 %v4278_v19  ;;  %3412 = vmatprep.subr.bf16.mxu0 %v4278_v19 }
 0x155   : > { %1283 = vadd.xlane.f32.xlu0 %v1282_v6 }
 0x157   : > { %3389 = vmatpush3.bf16.msra.mxu1 %v3670_v24  ;;  %3413 = vmatpush3.bf16.msra.mxu0 %v3671_v25  ;;  %p3289_p5 = scmp.ne.s32.totalorder %s5248_s4, 1 }
 0x158   : > { %3394 = vmatprep.subr.bf16.mxu1 %v4278_v19  ;;  %3430 = vmatprep.subr.bf16.mxu0 %v4278_v19  ;;  %s5249_s13 = sld [smem:[#allocation72_spill]] (!%p3289_p5) }
 0x159   : > { %s5250_s12 = sld [smem:[#allocation70_spill]] (!%p3289_p5) }
 0x15a   : > { %s5251_s0 = sld [smem:[#allocation73_spill]] (!%p3289_p5) }
 0x1da   : > { %v1281_v7 = vpop.xlane.xlu0 %1280 }
 0x1db   : > { %v1286_v8 = vmul.f32 0.015625, %v1281_v7 }
 0x1dd   : > { %v1288_v9 = vsub.f32 %v4838_v3, %v1286_v8 }
 0x1de   : > { %v1284_v10 = vpop.xlane.xlu0 %1283 }
 0x1df   : > { %v1287_v11 = vmul.f32 0.015625, %v1284_v10  ;;  %v1290_v12 = vmul.f32 %v1288_v9, %v1288_v9 }
 0x1e1   : > { %v1289_v13 = vsub.f32 %v4840_v4, %v1287_v11  ;;  %v1292_v14 = vsel %vm1278_vm1, %v1290_v12, 0.0 }
 0x1e2   : > { %1293 = vadd.xlane.f32.xlu1 %v1292_v14 }
 0x1e3   : > { %v1291_v15 = vmul.f32 %v1289_v13, %v1289_v13 }
 0x1e5   : > { %v1295_v16 = vsel %vm1278_vm1, %v1291_v15, 0.0 }
 0x1e6   : > { %1296 = vadd.xlane.f32.xlu1 %v1295_v16 }
 0x26b   : > { %v1294_v26 = vpop.xlane.xlu1 %1293 }
 0x26c   : > { %v1298_v27 = vmul.f32 0.015625, %v1294_v26 }
 0x26e   : > { %v1300_v28 = vadd.f32 1e-05, %v1298_v27 }
 0x26f   : > { %v1297_v29 = vpop.xlane.xlu1 %1296 }
 0x270   : > { %3721 = vrsqrt.f32 %v1300_v28  ;;  %v1299_v30 = vmul.f32 0.015625, %v1297_v29 }
 0x272   : > { %v1301_v31 = vadd.f32 1e-05, %v1299_v30 }
 0x274   : > { %3723 = vrsqrt.f32 %v1301_v31 }
 0x27d   : > { %v3722_v32 = vpop.eup %3721 }
 0x27e   : > { %v1304_v33 = vmul.f32 %v3722_v32, %v1288_v9 }
 0x280   : > { %v1312_v37 = vmul.f32 %v3199_v34, %v1304_v33 }
 0x281   : > { %v3724_v35 = vpop.eup %3723 }
 0x282   : > { %v1305_v36 = vmul.f32 %v3724_v35, %v1289_v13  ;;  %v1320_v40 = vadd.f32 %v3200_v38, %v1312_v37 }
 0x284   : > { %v1313_v39 = vmul.f32 %v3199_v34, %v1305_v36  ;;  %v3225_v34 = vld [vmem:[%s5243_s16] ss:$0 sm:$0xff] }
 0x286   : > { %v1321_v41 = vadd.f32 %v3200_v38, %v1313_v39 }
 0x288   : > { %v1322_v43 = vpack.c.bf16 %v1321_v41, %v1320_v40 }
 0x28a   : > { %3391 = vmatmul.mubr.msk.bf16.vlgmr.msra.gmra.mxu1 %vm1278_vm1, %v1322_v43  ;;  %3415 = vmatmul.mubr.msk.bf16.vlgmr.msra.gmra.mxu0 %vm1278_vm1, %v1322_v43 }
 0x28b   : > { %3395 = vmatpush3.bf16.msra.mxu1 %v3672_v42  ;;  %3402 = vmatprep.mubr.msk.bf16.mxu1 %vm4279_vm2, %v4278_v19 }
 0x28c   : > { %3396 = vmatprep.subr.bf16.mxu1 %v4278_v19  ;;  %3432 = vmatprep.mubr.msk.bf16.mxu0 %vm4279_vm2, %v4278_v19 }
 0x28f   : > { %3397 = vmatpush3.bf16.msra.mxu1 %v3673_v44 }
 0x290   : > { %3398 = vmatprep.subr.bf16.mxu1 %v4278_v19 }
 0x293   : > { %3399 = vmatpush3.bf16.msra.mxu1 %v3674_v45 }
 0x294   : > { %3400 = vmatprep.subr.bf16.mxu1 %v4278_v19 }
 0x297   : > { %3401 = vmatpush3.bf16.msra.mxu1 %v3675_v46 }
 0x298   : > { %3418 = vmatprep.subr.bf16.mxu1 %v4278_v19 }
 0x29a   : > { %3403 = vmatmul.mubr.msk.bf16.vlgmr.msra.gmra.mxu1 %vm1278_vm1, %v1322_v43 }
 0x29b   : > { %3420 = vmatprep.mubr.msk.bf16.mxu1 %vm4279_vm2, %v4278_v19 }
 0x34a   : > { %v1399_v49 = vpop.f32.mrf.mxu1  ;;  %v1559_v50 = vpop.f32.mrf.mxu0 }
 0x34b   : > { %v1400_v51 = vadd.f32 %v3201_v47, %v1399_v49  ;;  %v1560_v52 = vadd.f32 %v3213_v48, %v1559_v50 }
 0x34c   : > { %v3392_v53 = vpop.f32.mrf.mxu1  ;;  %v3416_v54 = vpop.f32.mrf.mxu0 }
 0x34d   : > { %v1566_v55 = vmul.f32 0.25, %v1400_v51  ;;  %v3309_v56 = vpack.c.bf16 %v1560_v52, %v1560_v52 }
 0x34e   : > { %v1402_v57 = vpop.f32.mrf.mxu1  ;;  %v1562_v58 = vpop.f32.mrf.mxu0 }
 0x34f   : > { %v3305_v59 = vpack.c.bf16 %v1566_v55, %v1566_v55  ;;  %1597 = vst.msk [vmem:[#allocation5] sm:$0xf] %vm1576_vm3, %v3309_v56  ;;  %v1403_v60 = vadd.f32 %v3201_v47, %v1402_v57  ;;  %v1563_v61 = vadd.f32 %v3213_v48, %v1562_v58 }
 0x350   : > { %v3393_v62 = vpop.f32.mrf.mxu1  ;;  %v3417_v63 = vpop.f32.mrf.mxu0 }
 0x351   : > { %1577 = vst.msk [vmem:[#allocation3] sm:$0xf] %vm1576_vm3, %v3305_v59  ;;  %v1567_v0 = vmul.f32 0.25, %v1403_v60  ;;  %v3310_v1 = vpack.c.bf16 %v1563_v61, %v1563_v61 }
 0x353   : > { %v3306_v2 = vpack.c.bf16 %v1567_v0, %v1567_v0  ;;  %1598 = vst.msk [vmem:[#allocation5 + $0x4] sm:$0xf] %vm1576_vm3, %v3310_v1 }
 0x355   : > { %1578 = vst.msk [vmem:[#allocation3 + $0x4] sm:$0xf] %vm1576_vm3, %v3306_v2 }
 0x35a   : > { %v1479_v6 = vpop.f32.mrf.mxu1  ;;  %v3684_v24 = vld [vmem:[#allocation5] sm:$0xff]  }
 0x35b   : > { %v1480_v7 = vadd.f32 %v3207_v5, %v1479_v6 }
 0x35c   : > { %v3404_v8 = vpop.f32.mrf.mxu1  ;;  %v3676_v9 = vld [vmem:[#allocation3] sm:$0xff]  }
 0x35d   : > { %v3307_v10 = vpack.c.bf16 %v1480_v7, %v1480_v7  ;;  %1762 = vrot.lane.b32.xlu1 %v3676_v9, %s4280_s7  ;;  %v3680_v20 = vld [vmem:[#allocation3] sm:$0xff]  }
 0x35e   : > { %v1482_v11 = vpop.f32.mrf.mxu1  ;;  %v3682_v22 = vld [vmem:[#allocation3] sm:$0xff]  }
 0x35f   : > { %1587 = vst.msk [vmem:[#allocation4] sm:$0xf] %vm1576_vm3, %v3307_v10  ;;  %v1483_v12 = vadd.f32 %v3207_v5, %v1482_v11  ;;  %v3683_v23 = vld [vmem:[#allocation3] sm:$0xff]  }
 0x360   : > { %v3405_v13 = vpop.f32.mrf.mxu1 }
 0x361   : > { %v3308_v14 = vpack.c.bf16 %v1483_v12, %v1483_v12 }
 0x363   : > { %1588 = vst.msk [vmem:[#allocation4 + $0x4] sm:$0xf] %vm1576_vm3, %v3308_v14 }
 0x36a   : > { %v3677_v15 = vld [vmem:[#allocation4] sm:$0xff]  }
 0x36b   : > { %v3678_v16 = vld [vmem:[#allocation4] sm:$0xff]   ;;  %1926 = vrot.lane.b32.xlu1 %v3677_v15, %s4281_s18 }
 0x36c   : > { %v3679_v17 = vld [vmem:[#allocation4] sm:$0xff]   ;;  %1769 = vrot.lane.b32.xlu0 %v3678_v16, %s4280_s7 }
 0x36d   : > { %v1624_v18 = vsel %vm1619_vm4, %v3679_v17, 0  ;;  %v3681_v21 = vld [vmem:[#allocation4] sm:$0xff]  }
 0x36e   : > { %3419 = vmatpush3.bf16.xpose.msra.mxu1 %v1624_v18 }
 0x36f   : > { %3424 = vmatprep.subr.bf16.mxu1 %v4278_v19  ;;  %1919 = vrot.lane.b32.xlu1 %v3680_v20, %s4281_s18 }
 0x370   : > { %2083 = vrot.lane.b32.xlu0 %v3681_v21, %s4282_s8 }
 0x373   : > { %2076 = vrot.lane.b32.xlu1 %v3682_v22, %s4282_s8 }
 0x375   : > { %3421 = vmatmul.mubr.msk.bf16.vlgmr.msra.gmra.mxu1 %vm1619_vm4, %v3683_v23 }
 0x376   : > { %3425 = vmatpush3.bf16.msra.mxu1 %v3684_v24  ;;  %3426 = vmatprep.mubr.msk.bf16.mxu1 %vm4279_vm2, %v4278_v19 }
 0x377   : > { %3436 = vmatprep.subr.bf16.mxu1 %v4278_v19 }
 0x3cf   : > { %v1763_v27 = vpop.permute.xlu1 %1762 }
 0x3dd   : > { %v1927_v28 = vpop.permute.xlu1 %1926 }
 0x3de   : > { %v1770_v25 = vpop.permute.xlu0 %1769  ;;  %v1932_v29 = vsel %vm1619_vm4, %v1927_v28, 0 }
 0x3df   : > { %v1775_v26 = vsel %vm1619_vm4, %v1770_v25, 0 }
 0x3e0   : > { %3431 = vmatpush3.bf16.xpose.msra.mxu0 %v1775_v26 }
 0x3e1   : > { %3442 = vmatprep.subr.bf16.mxu0 %v4278_v19  ;;  %v1920_v31 = vpop.permute.xlu1 %1919 }
 0x3e2   : > { %v2084_v30 = vpop.permute.xlu0 %2083 }
 0x3e3   : > { %v2089_v32 = vsel %vm1619_vm4, %v2084_v30, 0 }
 0x3e5   : > { %v2077_v33 = vpop.permute.xlu1 %2076 }
 0x3e7   : > { %3433 = vmatmul.mubr.msk.bf16.vlgmr.msra.gmra.mxu0 %vm1619_vm4, %v1763_v27 }
 0x3e8   : > { %3443 = vmatpush3.bf16.xpose.msra.mxu0 %v1932_v29  ;;  %3444 = vmatprep.mubr.msk.bf16.mxu0 %vm4279_vm2, %v4278_v19 }
 0x3e9   : > { %3454 = vmatprep.subr.bf16.mxu0 %v4278_v19 }
 0x3ef   : > { %3445 = vmatmul.mubr.msk.bf16.vlgmr.msra.gmra.mxu0 %vm1619_vm4, %v1920_v31 }
 0x3f0   : > { %3455 = vmatpush3.bf16.xpose.msra.mxu0 %v2089_v32  ;;  %3456 = vmatprep.mubr.msk.bf16.mxu0 %vm4279_vm2, %v4278_v19 }
 0x3f1   : > { %3466 = vmatprep.subr.bf16.mxu0 %v4278_v19 }
 0x3f7   : > { %3457 = vmatmul.mubr.msk.bf16.vlgmr.msra.gmra.mxu0 %vm1619_vm4, %v2077_v33 }
 0x3f8   : > { %3474 = vmatprep.mubr.msk.bf16.mxu0 %vm4279_vm2, %v4278_v19 }
 0x435   : > { %v1660_v35 = vpop.f32.mrf.mxu1 }
 0x436   : > { %v1661_v36 = vadd.f32 %v3225_v34, %v1660_v35 }
 0x437   : > { %v3422_v37 = vpop.f32.mrf.mxu1 }
 0x438   : > { %v1667_v38 = vsel %vm1619_vm4, %v1661_v36, -inf }
 0x439   : > { %1668 = vmax.xlane.f32.xlu0 %v1667_v38  ;;  %v1663_v39 = vpop.f32.mrf.mxu1 }
 0x43a   : > { %v1664_v40 = vadd.f32 %v3225_v34, %v1663_v39 }
 0x43b   : > { %v3423_v41 = vpop.f32.mrf.mxu1 }
 0x43c   : > { %v1670_v42 = vsel %vm1619_vm4, %v1664_v40, -inf }
 0x43d   : > { %1671 = vmax.xlane.f32.xlu1 %v1670_v42 }
 0x4a7   : > { %v1811_v43 = vpop.f32.mrf.mxu0 }
 0x4a8   : > { %v1812_v44 = vadd.f32 %v3225_v34, %v1811_v43 }
 0x4a9   : > { %v3434_v45 = vpop.f32.mrf.mxu0 }
 0x4aa   : > { %v1818_v46 = vsel %vm1619_vm4, %v1812_v44, -inf  ;;  %v3686_v45 = vld [vmem:[#allocation5] sm:$0xff]  }
 0x4ab   : > { %v1814_v47 = vpop.f32.mrf.mxu0  ;;  %1819 = vmax.xlane.f32.xlu0 %v1818_v46 }
 0x4ac   : > { %v1815_v48 = vadd.f32 %v3225_v34, %v1814_v47 }
 0x4ad   : > { %v3435_v49 = vpop.f32.mrf.mxu0 }
 0x4ae   : > { %v1821_v50 = vsel %vm1619_vm4, %v1815_v48, -inf }
 0x4af   : > { %v1968_v51 = vpop.f32.mrf.mxu0  ;;  %1822 = vmax.xlane.f32.xlu0 %v1821_v50 }
 0x4b0   : > { %v1969_v52 = vadd.f32 %v3225_v34, %v1968_v51 }
 0x4b1   : > { %v3446_v53 = vpop.f32.mrf.mxu0 }
 0x4b2   : > { %v1975_v54 = vsel %vm1619_vm4, %v1969_v52, -inf }
 0x4b3   : > { %v1971_v55 = vpop.f32.mrf.mxu0  ;;  %1976 = vmax.xlane.f32.xlu0 %v1975_v54 }
 0x4b4   : > { %v1972_v56 = vadd.f32 %v3225_v34, %v1971_v55  ;;  %v3687_v55 = vld [vmem:[#allocation5] sm:$0xff]  }
 0x4b5   : > { %v3447_v57 = vpop.f32.mrf.mxu0 }
 0x4b6   : > { %v1978_v58 = vsel %vm1619_vm4, %v1972_v56, -inf }
 0x4b7   : > { %v2125_v59 = vpop.f32.mrf.mxu0  ;;  %1979 = vmax.xlane.f32.xlu1 %v1978_v58 }
 0x4b8   : > { %v2126_v60 = vadd.f32 %v3225_v34, %v2125_v59 }
 0x4b9   : > { %v3458_v61 = vpop.f32.mrf.mxu0 }
 0x4ba   : > { %v2132_v62 = vsel %vm1619_vm4, %v2126_v60, -inf }
 0x4bb   : > { %v2128_v63 = vpop.f32.mrf.mxu0  ;;  %2133 = vmax.xlane.f32.xlu0 %v2132_v62 }
 0x4bc   : > { %v4941_v0 = vadd.f32 %v3225_v34, %v2128_v63 }
 0x4bd   : > { %v3459_v1 = vpop.f32.mrf.mxu0 }
 0x4be   : > { %v2135_v2 = vsel %vm1619_vm4, %v4941_v0, -inf }
 0x4bf   : > { %2136 = vmax.xlane.f32.xlu1 %v2135_v2 }
 0x4c2   : > { %v1669_v5 = vpop.xlane.xlu0 %1668 }
 0x4c3   : > { %v1673_v6 = vsub.f32 %v1661_v36, %v1669_v5 }
 0x4c5   : > { %v1675_v7 = vmul.f32 1.442695, %v1673_v6 }
 0x4c6   : > { %v1672_v8 = vpop.xlane.xlu1 %1671 }
 0x4c7   : > { %3725 = vpow2.f32 %v1675_v7  ;;  %v1674_v9 = vsub.f32 %v1664_v40, %v1672_v8 }
 0x4c9   : > { %v1677_v10 = vmul.f32 1.442695, %v1674_v9 }
 0x4cb   : > { %3727 = vpow2.f32 %v1677_v10 }
 0x4d4   : > { %v3726_v11 = vpop.eup %3725 }
 0x4d5   : > { %v1679_v12 = vsel %vm1619_vm4, %v3726_v11, 0.0 }
 0x4d6   : > { %1680 = vadd.xlane.f32.xlu0 %v1679_v12 }
 0x4d8   : > { %v3728_v13 = vpop.eup %3727 }
 0x4d9   : > { %v1682_v14 = vsel %vm1619_vm4, %v3728_v13, 0.0 }
 0x4da   : > { %1683 = vadd.xlane.f32.xlu1 %v1682_v14 }
 0x534   : > { %v1820_v15 = vpop.xlane.xlu0 %1819 }
 0x535   : > { %v1824_v16 = vsub.f32 %v1812_v44, %v1820_v15  ;;  %v3685_v44 = vld [vmem:[#allocation5] sm:$0xff]  }
 0x537   : > { %v1826_v17 = vmul.f32 1.442695, %v1824_v16 }
 0x538   : > { %v1823_v18 = vpop.xlane.xlu0 %1822 }
 0x539   : > { %3729 = vpow2.f32 %v1826_v17  ;;  %v1825_v20 = vsub.f32 %v1815_v48, %v1823_v18 }
 0x53b   : > { %v1828_v21 = vmul.f32 1.442695, %v1825_v20 }
 0x53c   : > { %v1977_v22 = vpop.xlane.xlu0 %1976 }
 0x53d   : > { %3731 = vpow2.f32 %v1828_v21  ;;  %v1981_v23 = vsub.f32 %v1969_v52, %v1977_v22 }
 0x53f   : > { %v1983_v24 = vmul.f32 1.442695, %v1981_v23 }
 0x540   : > { %v1980_v25 = vpop.xlane.xlu1 %1979 }
 0x541   : > { %3733 = vpow2.f32 %v1983_v24  ;;  %v1982_v26 = vsub.f32 %v1972_v56, %v1980_v25 }
 0x543   : > { %v1985_v27 = vmul.f32 1.442695, %v1982_v26 }
 0x544   : > { %v2134_v28 = vpop.xlane.xlu0 %2133 }
 0x545   : > { %3735 = vpow2.f32 %v1985_v27  ;;  %v2138_v29 = vsub.f32 %v2126_v60, %v2134_v28  ;;  %v3688_v28 = vld [vmem:[%s4819_s1 + $0x18] sm:$0xff]  }
 0x546   : > { %v3730_v30 = vpop.eup %3729  ;;  %3467 = vmatpush3.bf16.msra.mxu0 %v3688_v28  ;;  %v3261_v28 = vld [vmem:[%s5245_s19] ss:$0 sm:$0xff] }
 0x547   : > { %v2140_v31 = vmul.f32 1.442695, %v2138_v29  ;;  %v1830_v32 = vsel %vm1619_vm4, %v3730_v30, 0.0  ;;  %3468 = vmatprep.subr.bf16.mxu0 %v4278_v19 }
 0x548   : > { %1831 = vadd.xlane.f32.xlu0 %v1830_v32  ;;  %v2137_v41 = vpop.xlane.xlu1 %2136 }
 0x549   : > { %3737 = vpow2.f32 %v2140_v31  ;;  %v2139_v48 = vsub.f32 %v4941_v0, %v2137_v41 }
 0x54a   : > { %v3732_v33 = vpop.eup %3731 }
 0x54b   : > { %v1833_v34 = vsel %vm1619_vm4, %v3732_v33, 0.0  ;;  %v2142_v52 = vmul.f32 1.442695, %v2139_v48 }
 0x54c   : > { %1834 = vadd.xlane.f32.xlu1 %v1833_v34 }
 0x54e   : > { %v3734_v35 = vpop.eup %3733 }
 0x54f   : > { %v1987_v36 = vsel %vm1619_vm4, %v3734_v35, 0.0 }
 0x550   : > { %1988 = vadd.xlane.f32.xlu0 %v1987_v36 }
 0x552   : > { %v3736_v37 = vpop.eup %3735 }
 0x553   : > { %v1990_v38 = vsel %vm1619_vm4, %v3736_v37, 0.0 }
 0x554   : > { %1991 = vadd.xlane.f32.xlu1 %v1990_v38  ;;  %v3689_v38 = vld [vmem:[%s4819_s1 + $0x10] sm:$0xff]  }
 0x555   : > { %3469 = vmatpush3.bf16.msra.mxu0 %v3689_v38  ;;  %v3706_v38 = vld [vmem:[%s4829_s3 + $0x38] sm:$0xff]  }
 0x556   : > { %v4951_v39 = vpop.eup %3737  ;;  %3470 = vmatprep.subr.bf16.mxu0 %v4278_v19 }
 0x557   : > { %v2144_v40 = vsel %vm1619_vm4, %v4951_v39, 0.0 }
 0x558   : > { %2145 = vadd.xlane.f32.xlu0 %v2144_v40  ;;  %v3691_v40 = vld [vmem:[%s4819_s1] sm:$0xff]  }
 0x55f   : > { %v1681_v42 = vpop.xlane.xlu0 %1680 }
 0x560   : > { %3739 = vrcp.f32 %v1681_v42 }
 0x563   : > { %v1684_v43 = vpop.xlane.xlu1 %1683 }
 0x564   : > { %3741 = vrcp.f32 %v1684_v43 }
 0x565   : > { %2005 = vrot.lane.b32.xlu1 %v3685_v44, %s4281_s18  ;;  %3743 = vpow2.f32 %v2142_v52 }
 0x56d   : > { %v3740_v46 = vpop.eup %3739 }
 0x56e   : > { %1848 = vrot.lane.b32.xlu0 %v3686_v45, %s4280_s7  ;;  %v1687_v49 = vmul.f32 %v3740_v46, %v3726_v11 }
 0x571   : > { %v3742_v47 = vpop.eup %3741 }
 0x572   : > { %v1688_v50 = vmul.f32 %v3742_v47, %v3728_v13  ;;  %v3744_v53 = vpop.eup %3743 }
 0x573   : > { %v2147_v54 = vsel %vm1619_vm4, %v3744_v53, 0.0 }
 0x574   : > { %v1689_v51 = vpack.c.bf16 %v1688_v50, %v1687_v49 }
 0x576   : > { %3427 = vmatmul.mubr.msk.bf16.vlgmr.msra.gmra.mxu1 %vm1619_vm4, %v1689_v51 }
 0x577   : > { %3438 = vmatprep.mubr.msk.bf16.mxu1 %vm4279_vm2, %v4278_v19 }
 0x589   : > { %2148 = vadd.xlane.f32.xlu1 %v2147_v54 }
 0x59a   : > { %2162 = vrot.lane.b32.xlu1 %v3687_v55, %s4282_s8  ;;  %s5252_s8 = sld [smem:[#allocation74_spill]] (!%p3289_p5) }
 0x5d1   : > { %v1832_v56 = vpop.xlane.xlu0 %1831 }
 0x5d2   : > { %3745 = vrcp.f32 %v1832_v56 }
 0x5d5   : > { %v1835_v57 = vpop.xlane.xlu1 %1834 }
 0x5d6   : > { %3747 = vrcp.f32 %v1835_v57 }
 0x5d9   : > { %v1989_v58 = vpop.xlane.xlu0 %1988 }
 0x5da   : > { %3749 = vrcp.f32 %v1989_v58 }
 0x5dd   : > { %v1992_v59 = vpop.xlane.xlu1 %1991 }
 0x5de   : > { %3751 = vrcp.f32 %v1992_v59 }
 0x5df   : > { %v3746_v60 = vpop.eup %3745 }
 0x5e0   : > { %v1838_v63 = vmul.f32 %v3746_v60, %v3730_v30 }
 0x5e1   : > { %v2146_v61 = vpop.xlane.xlu0 %2145  ;;  %v2006_v6 = vpop.permute.xlu1 %2005 }
 0x5e2   : > { %3753 = vrcp.f32 %v2146_v61 }
 0x5e3   : > { %v3748_v62 = vpop.eup %3747 }
 0x5e4   : > { %v1839_v0 = vmul.f32 %v3748_v62, %v3732_v33 }
 0x5e5   : > { %v1849_v1 = vpop.permute.xlu0 %1848 }
 0x5e6   : > { %3437 = vmatpush3.bf16.msra.mxu1 %v1849_v1  ;;  %v1840_v2 = vpack.c.bf16 %v1839_v0, %v1838_v63 }
 0x5e7   : > { %3448 = vmatprep.subr.bf16.mxu1 %v4278_v19  ;;  %v3750_v5 = vpop.eup %3749 }
 0x5e8   : > { %v1995_v8 = vmul.f32 %v3750_v5, %v3734_v35 }
 0x5e9   : > { %3439 = vmatmul.mubr.msk.bf16.vlgmr.msra.gmra.mxu1 %vm1619_vm4, %v1840_v2 }
 0x5ea   : > { %3449 = vmatpush3.bf16.msra.mxu1 %v2006_v6  ;;  %3450 = vmatprep.mubr.msk.bf16.mxu1 %vm4279_vm2, %v4278_v19 }
 0x5eb   : > { %v3752_v7 = vpop.eup %3751  ;;  %3460 = vmatprep.subr.bf16.mxu1 %v4278_v19 }
 0x5ec   : > { %v1996_v9 = vmul.f32 %v3752_v7, %v3736_v37 }
 0x5ee   : > { %v1997_v10 = vpack.c.bf16 %v1996_v9, %v1995_v8 }
 0x5ef   : > { %v3754_v13 = vpop.eup %3753 }
 0x5f0   : > { %v2152_v15 = vmul.f32 %v3754_v13, %v4951_v39  ;;  %v3690_v39 = vld [vmem:[%s4819_s1 + $0x8] sm:$0xff]   ;;  %s5244_s1 = scalar_lea.vmem [#allocation19], %s4748_s28 }
 0x5f1   : > { %3451 = vmatmul.mubr.msk.bf16.vlgmr.msra.gmra.mxu1 %vm1619_vm4, %v1997_v10  ;;  %3471 = vmatpush3.bf16.msra.mxu0 %v3690_v39  ;;  %v3695_v10 = vld [vmem:[%s4824_s11 + $0x34] ss:$8 sps:$4 sm:$0xff]   ;;  %v3696_v13 = vld [vmem:[%s4824_s11 + $0x20] ss:$8 sps:$4 sm:$0xff]  }
 0x5f2   : > { %3462 = vmatprep.mubr.msk.bf16.mxu1 %vm4279_vm2, %v4278_v19  ;;  %3472 = vmatprep.subr.bf16.mxu0 %v4278_v19  ;;  %v3707_v39 = vld [vmem:[%s4829_s3 + $0x70] sm:$0xff]  }
 0x5f5   : > { %3473 = vmatpush3.bf16.msra.mxu0 %v3691_v40  ;;  %v3708_v40 = vld [vmem:[%s4829_s3 + $0x30] sm:$0xff]  }
 0x612   : > { %v2149_v11 = vpop.xlane.xlu1 %2148 }
 0x613   : > { %3755 = vrcp.f32 %v2149_v11  ;;  %v3693_v11 = vld [vmem:[%s4824_s11 + $0x30] ss:$8 sps:$4 sm:$0xff]  }
 0x616   : > { %v2163_v12 = vpop.permute.xlu1 %2162 }
 0x617   : > { %3461 = vmatpush3.bf16.msra.mxu1 %v2163_v12  ;;  %v3698_v12 = vld [vmem:[%s4824_s11 + $0x24] ss:$8 sps:$4 sm:$0xff]  }
 0x618   : > { %2432 = vmatprep.subr.bf16.mxu1 %v3695_v10 }
 0x620   : > { %v3756_v14 = vpop.eup %3755 }
 0x621   : > { %v2153_v16 = vmul.f32 %v3756_v14, %v3744_v53  ;;  %v3254_v53 = vld [vmem:[%s5244_s1] ss:$0 sm:$0xff]  ;;  %v3699_v14 = vld [vmem:[%s4824_s11 + $0x10] ss:$8 sps:$4 sm:$0xff]  }
 0x623   : > { %v2154_v17 = vpack.c.bf16 %v2153_v16, %v2152_v15  ;;  %v3701_v15 = vld [vmem:[%s4824_s11 + $0x14] ss:$8 sps:$4 sm:$0xff]   ;;  %v3704_v16 = vld [vmem:[%s4824_s11 + $0x4] ss:$8 sps:$4 sm:$0xff]  }
 0x625   : > { %3463 = vmatmul.mubr.msk.bf16.vlgmr.msra.gmra.mxu1 %vm1619_vm4, %v2154_v17  ;;  %v4286_v17 = vmov 0  }
 0x626   : > { %2433 = vmatpush1.bf16.msra.mxu1 %v3693_v11  ;;  %2456 = vmatprep.mubr.bf16.mxu1 %v4286_v17 }
 0x627   : > { %2434 = vmatprep.subr.bf16.mxu1 %v3698_v12 }
 0x62a   : > { %2435 = vmatpush1.bf16.msra.mxu1 %v3696_v13 }
 0x62b   : > { %2436 = vmatprep.subr.bf16.mxu1 %v3701_v15 }
 0x62e   : > { %2437 = vmatpush1.bf16.msra.mxu1 %v3699_v14 }
 0x62f   : > { %2438 = vmatprep.subr.bf16.mxu1 %v3704_v16 }
 0x636   : > { %v1735_v18 = vpop.f32.mrf.mxu1 }
 0x637   : > { %v3311_v20 = vpack.c.bf16 %v1735_v18, %v1735_v18  ;;  %v3702_v18 = vld [vmem:[%s4824_s11] ss:$8 sps:$4 sm:$0xff]  }
 0x638   : > { %v3428_v21 = vpop.f32.mrf.mxu1  ;;  %2439 = vmatpush1.bf16.msra.mxu1 %v3702_v18 }
 0x639   : > { %1751 = vst.msk [vmem:[#allocation6] sm:$0xf] %vm1750_vm5, %v3311_v20 }
 0x63a   : > { %v1738_v22 = vpop.f32.mrf.mxu1 }
 0x63b   : > { %v3312_v23 = vpack.c.bf16 %v1738_v22, %v1738_v22 }
 0x63c   : > { %v3429_v24 = vpop.f32.mrf.mxu1 }
 0x63d   : > { %1752 = vst.msk [vmem:[#allocation6 + $0x4] sm:$0xf] %vm1750_vm5, %v3312_v23 }
 0x6a9   : > { %v1888_v25 = vpop.f32.mrf.mxu1 }
 0x6aa   : > { %v3313_v26 = vpack.c.bf16 %v1888_v25, %v1888_v25 }
 0x6ab   : > { %v3440_v27 = vpop.f32.mrf.mxu1 }
 0x6ac   : > { %1901 = vrot.lane.b32.xlu1 %v3313_v26, %s4283_s14 }
 0x6ad   : > { %v1891_v29 = vpop.f32.mrf.mxu1 }
 0x6ae   : > { %v3314_v30 = vpack.c.bf16 %v1891_v29, %v1891_v29 }
 0x6af   : > { %v3441_v31 = vpop.f32.mrf.mxu1 }
 0x6b0   : > { %1903 = vrot.lane.b32.xlu0 %v3314_v30, %s4283_s14 }
 0x6b1   : > { %v2045_v32 = vpop.f32.mrf.mxu1 }
 0x6b2   : > { %v3315_v33 = vpack.c.bf16 %v2045_v32, %v2045_v32  ;;  %v3262_v32 = vld [vmem:[%s5246_s6] ss:$0 sm:$0xff] }
 0x6b3   : > { %v3452_v34 = vpop.f32.mrf.mxu1 }
 0x6b4   : > { %2058 = vrot.lane.b32.xlu1 %v3315_v33, %s4284_s10 }
 0x6b5   : > { %v2048_v35 = vpop.f32.mrf.mxu1 }
 0x6b6   : > { %v3316_v36 = vpack.c.bf16 %v2048_v35, %v2048_v35 }
 0x6b7   : > { %v3453_v37 = vpop.f32.mrf.mxu1 }
 0x6b8   : > { %2060 = vrot.lane.b32.xlu0 %v3316_v36, %s4284_s10  ;;  %v3705_v37 = vld [vmem:[%s4829_s3 + $0x78] sm:$0xff]  }
 0x6b9   : > { %3355 = vmatprep.subr.bf16.mxu0 %v3705_v37 }
 0x6e5   : > { %v2202_v41 = vpop.f32.mrf.mxu1 }
 0x6e6   : > { %v3317_v42 = vpack.c.bf16 %v2202_v41, %v2202_v41  ;;  %v3709_v41 = vld [vmem:[%s4829_s3 + $0x68] sm:$0xff]  }
 0x6e7   : > { %v3464_v43 = vpop.f32.mrf.mxu1 }
 0x6e8   : > { %2215 = vrot.lane.b32.xlu1 %v3317_v42, %s4285_s5  ;;  %v3710_v42 = vld [vmem:[%s4829_s3 + $0x28] sm:$0xff]   ;;  %v3711_v43 = vld [vmem:[%s4829_s3 + $0x60] sm:$0xff]  }
 0x6e9   : > { %v2205_v44 = vpop.f32.mrf.mxu1 }
 0x6ea   : > { %v3318_v45 = vpack.c.bf16 %v2205_v44, %v2205_v44  ;;  %v3712_v44 = vld [vmem:[%s4829_s3 + $0x20] sm:$0xff]  }
 0x6eb   : > { %v3465_v46 = vpop.f32.mrf.mxu1 }
 0x6ec   : > { %2217 = vrot.lane.b32.xlu0 %v3318_v45, %s4285_s5  ;;  %v3713_v45 = vld [vmem:[%s4829_s3 + $0x58] sm:$0xff]  }
 0x6ed   : > { %v3714_v46 = vld [vmem:[%s4829_s3 + $0x18] sm:$0xff]  }
 0x71e   : > { %v1902_v47 = vpop.permute.xlu1 %1901 }
 0x71f   : > { %1908 = vst.msk [vmem:[#allocation6] sm:$0xf] %vm1907_vm6, %v1902_v47  ;;  %v3715_v47 = vld [vmem:[%s4829_s3 + $0x50] sm:$0xff]  }
 0x722   : > { %v1904_v48 = vpop.permute.xlu0 %1903 }
 0x723   : > { %1909 = vst.msk [vmem:[#allocation6 + $0x4] sm:$0xf] %vm1907_vm6, %v1904_v48  ;;  %v3716_v48 = vld [vmem:[%s4829_s3 + $0x10] sm:$0xff]  }
 0x726   : > { %v2059_v49 = vpop.permute.xlu1 %2058 }
 0x727   : > { %2065 = vst.msk [vmem:[#allocation6] sm:$0xf] %vm2064_vm7, %v2059_v49  ;;  %v3717_v49 = vld [vmem:[%s4829_s3 + $0x48] sm:$0xff]  }
 0x72a   : > { %v2061_v19 = vpop.permute.xlu0 %2060 }
 0x72b   : > { %2066 = vst.msk [vmem:[#allocation6 + $0x4] sm:$0xf] %vm2064_vm7, %v2061_v19  ;;  %v3718_v19 = vld [vmem:[%s4829_s3 + $0x8] sm:$0xff]  }
 0x75a   : > { %v2216_v50 = vpop.permute.xlu1 %2215 }
 0x75b   : > { %2222 = vst.msk [vmem:[#allocation6] sm:$0xf] %vm2221_vm8, %v2216_v50  ;;  %v3719_v50 = vld [vmem:[%s4829_s3 + $0x40] sm:$0xff]  }
 0x75e   : > { %v2218_v51 = vpop.permute.xlu0 %2217 }
 0x75f   : > { %2223 = vst.msk [vmem:[#allocation6 + $0x4] sm:$0xf] %vm2221_vm8, %v2218_v51  ;;  %v3720_v51 = vld [vmem:[%s4829_s3] sm:$0xff]  }
 0x766   : > { %v3692_v52 = vld [vmem:[#allocation6] sm:$0xff]  }
 0x767   : > { %3475 = vmatmul.mubr.msk.bf16.vlgmr.msra.gmra.mxu0 %vm1278_vm1, %v3692_v52  ;;  %v2371_v52 = vlaneseq }
 0x768   : > { %3356 = vmatpush3.bf16.msra.mxu0 %v3706_v38 }
 0x769   : > { %3357 = vmatprep.subr.bf16.mxu0 %v3707_v39 }
 0x76c   : > { %3358 = vmatpush3.bf16.msra.mxu0 %v3708_v40 }
 0x76d   : > { %3359 = vmatprep.subr.bf16.mxu0 %v3709_v41 }
 0x770   : > { %3360 = vmatpush3.bf16.msra.mxu0 %v3710_v42 }
 0x771   : > { %3361 = vmatprep.subr.bf16.mxu0 %v3711_v43 }
 0x774   : > { %3362 = vmatpush3.bf16.msra.mxu0 %v3712_v44 }
 0x775   : > { %3363 = vmatprep.subr.bf16.mxu0 %v3713_v45 }
 0x778   : > { %3364 = vmatpush3.bf16.msra.mxu0 %v3714_v46 }
 0x779   : > { %3365 = vmatprep.subr.bf16.mxu0 %v3715_v47 }
 0x77c   : > { %3366 = vmatpush3.bf16.msra.mxu0 %v3716_v48 }
 0x77d   : > { %3367 = vmatprep.subr.bf16.mxu0 %v3717_v49 }
 0x780   : > { %3368 = vmatpush3.bf16.msra.mxu0 %v3718_v19 }
 0x781   : > { %3369 = vmatprep.subr.bf16.mxu0 %v3719_v50 }
 0x784   : > { %3370 = vmatpush3.bf16.msra.mxu0 %v3720_v51 }
 0x827   : > { %v2307_v54 = vpop.f32.mrf.mxu0 }
 0x828   : > { %v2308_v55 = vadd.f32 %v3254_v53, %v2307_v54 }
 0x829   : > { %v3476_v56 = vpop.f32.mrf.mxu0 }
 0x82a   : > { %v4984_v57 = vadd.f32 %v2308_v55, %v4838_v3  ;;  %v2369_v55 = vld [vmem:[%s4783_s20] sm:$0x3]  ;;  %s5247_s20 = scalar_lea.vmem [#allocation25], %s4748_s28 }
 0x82b   : > { %v2310_v58 = vpop.f32.mrf.mxu0  ;;  %v3272_v45 = vld [vmem:[%s5247_s20] ss:$0 sm:$0xff] }
 0x82c   : > { %v2311_v59 = vadd.f32 %v3254_v53, %v2310_v58  ;;  %v2318_v60 = vsel %vm1278_vm1, %v4984_v57, 0.0  ;;  %v2372_v53 = vshrl.u32 %v2371_v52, 7 }
 0x82d   : > { %2319 = vadd.xlane.f32.xlu1 %v2318_v60  ;;  %v3477_v61 = vpop.f32.mrf.mxu0 }
 0x82e   : > { %v4989_v62 = vadd.f32 %v2311_v59, %v4840_v4  ;;  %v2373_v54 = vsub.s32 0, %v2372_v53  ;;  %v2377_v56 = vsub.s32 1, %v2372_v53 }
 0x830   : > { %v2321_v63 = vsel %vm1278_vm1, %v4989_v62, 0.0  ;;  %v2374_v58 = vrot.slane %v2369_v55, %v2373_v54  ;;  %v2378_v59 = vrot.slane %v2369_v55, %v2377_v56 }
 0x831   : > { %2322 = vadd.xlane.f32.xlu0 %v2321_v63 }
 0x8b6   : > { %v2320_v0 = vpop.xlane.xlu1 %2319 }
 0x8b7   : > { %v2324_v3 = vmul.f32 0.015625, %v2320_v0 }
 0x8b9   : > { %v2326_v1 = vsub.f32 %v4984_v57, %v2324_v3 }
 0x8ba   : > { %v2323_v2 = vpop.xlane.xlu0 %2322 }
 0x8bb   : > { %v2325_v5 = vmul.f32 0.015625, %v2323_v2  ;;  %v2328_v6 = vmul.f32 %v2326_v1, %v2326_v1 }
 0x8bd   : > { %v2327_v7 = vsub.f32 %v4989_v62, %v2325_v5  ;;  %v2330_v4 = vsel %vm1278_vm1, %v2328_v6, 0.0 }
 0x8be   : > { %2331 = vadd.xlane.f32.xlu0 %v2330_v4 }
 0x8bf   : > { %v2329_v8 = vmul.f32 %v2327_v7, %v2327_v7 }
 0x8c1   : > { %v2333_v9 = vsel %vm1278_vm1, %v2329_v8, 0.0 }
 0x8c2   : > { %2334 = vadd.xlane.f32.xlu0 %v2333_v9 }
 0x947   : > { %v2332_v20 = vpop.xlane.xlu0 %2331 }
 0x948   : > { %v2336_v21 = vmul.f32 0.015625, %v2332_v20 }
 0x94a   : > { %v2338_v22 = vadd.f32 1e-05, %v2336_v21 }
 0x94b   : > { %v2335_v23 = vpop.xlane.xlu0 %2334 }
 0x94c   : > { %3757 = vrsqrt.f32 %v2338_v22  ;;  %v2337_v24 = vmul.f32 0.015625, %v2335_v23 }
 0x94e   : > { %v2339_v25 = vadd.f32 1e-05, %v2337_v24 }
 0x950   : > { %3759 = vrsqrt.f32 %v2339_v25 }
 0x959   : > { %v3758_v26 = vpop.eup %3757 }
 0x95a   : > { %v2342_v27 = vmul.f32 %v3758_v26, %v2326_v1 }
 0x95c   : > { %v2350_v31 = vmul.f32 %v3261_v28, %v2342_v27 }
 0x95d   : > { %v3760_v29 = vpop.eup %3759 }
 0x95e   : > { %v2343_v30 = vmul.f32 %v3760_v29, %v2327_v7  ;;  %v2358_v34 = vadd.f32 %v3262_v32, %v2350_v31 }
 0x960   : > { %v2351_v33 = vmul.f32 %v3261_v28, %v2343_v30 }
 0x962   : > { %v2359_v35 = vadd.f32 %v3262_v32, %v2351_v33 }
 0x964   : > { %v2360_v36 = vpack.c.bf16 %v2359_v35, %v2358_v34 }
 0x966   : > { %3271 = vmatmul.mubr.msk.bf16.vlgmr.msra.gmra.mxu1 %vm1278_vm1, %v2360_v36 }
 0xa26   : > { %v2458_v60 = vpop.f32.mrf.mxu1 }
 0xa27   : > { %v2459_v61 = vadd.f32 %v2458_v60, %v2374_v58 }
 0xa28   : > { %v2460_v63 = vpop.f32.mrf.mxu1 }
 0xa29   : > { %v2471_v0 = vmul.f32 0.044715, %v2459_v61  ;;  %v2461_v3 = vadd.f32 %v2460_v63, %v2378_v59  ;;  %v2467_v37 = vmul.f32 0.5, %v2459_v61 }
 0xa2a   : > { %v2462_v1 = vpop.f32.mrf.mxu1 }
 0xa2b   : > { %v2475_v2 = vmul.f32 %v2471_v0, %v2459_v61  ;;  %v2472_v5 = vmul.f32 0.044715, %v2461_v3  ;;  %v2463_v6 = vadd.f32 %v2462_v1, %v2374_v58  ;;  %v2468_v34 = vmul.f32 0.5, %v2461_v3 }
 0xa2c   : > { %v2464_v7 = vpop.f32.mrf.mxu1 }
 0xa2d   : > { %v2479_v4 = vmul.f32 %v2475_v2, %v2459_v61  ;;  %v2476_v8 = vmul.f32 %v2472_v5, %v2461_v3  ;;  %v2473_v9 = vmul.f32 0.044715, %v2463_v6  ;;  %v2465_v10 = vadd.f32 %v2464_v7, %v2378_v59 }
 0xa2e   : > { %v2469_v32 = vmul.f32 0.5, %v2463_v6 }
 0xa2f   : > { %v2483_v11 = vadd.f32 %v2479_v4, %v2459_v61  ;;  %v2480_v12 = vmul.f32 %v2476_v8, %v2461_v3  ;;  %v2477_v13 = vmul.f32 %v2473_v9, %v2463_v6  ;;  %v2474_v14 = vmul.f32 0.044715, %v2465_v10 }
 0xa30   : > { %v2470_v35 = vmul.f32 0.5, %v2465_v10 }
 0xa31   : > { %v2481_v15 = vmul.f32 %v2477_v13, %v2463_v6  ;;  %v2478_v16 = vmul.f32 %v2474_v14, %v2465_v10  ;;  %v2484_v17 = vadd.f32 %v2480_v12, %v2461_v3  ;;  %v2487_v18 = vmul.f32 0.7978846, %v2483_v11 }
 0xa33   : > { %v2485_v20 = vadd.f32 %v2481_v15, %v2463_v6  ;;  %v2482_v21 = vmul.f32 %v2478_v16, %v2465_v10  ;;  %v2488_v22 = vmul.f32 0.7978846, %v2484_v17 }
 0xa35   : > { %v2489_v23 = vmul.f32 0.7978846, %v2485_v20  ;;  %v2486_v24 = vadd.f32 %v2482_v21, %v2465_v10  ;;  %3761 = vtanh.f32 %v2488_v22 }
 0xa36   : > { %3763 = vtanh.f32 %v2487_v18 }
 0xa37   : > { %3765 = vtanh.f32 %v2489_v23  ;;  %v2490_v25 = vmul.f32 0.7978846, %v2486_v24 }
 0xa39   : > { %3767 = vtanh.f32 %v2490_v25 }
 0xa42   : > { %v3762_v26 = vpop.eup %3761 }
 0xa43   : > { %v3764_v27 = vpop.eup %3763  ;;  %v2496_v29 = vadd.f32 1.0, %v3762_v26 }
 0xa44   : > { %v3766_v28 = vpop.eup %3765  ;;  %v2495_v33 = vadd.f32 1.0, %v3764_v27 }
 0xa45   : > { %v2497_v30 = vadd.f32 1.0, %v3766_v28  ;;  %v2500_v39 = vmul.f32 %v2496_v29, %v2468_v34 }
 0xa46   : > { %v3768_v31 = vpop.eup %3767  ;;  %v2499_v41 = vmul.f32 %v2495_v33, %v2467_v37 }
 0xa47   : > { %v2498_v36 = vadd.f32 1.0, %v3768_v31  ;;  %v2501_v38 = vmul.f32 %v2497_v30, %v2469_v32 }
 0xa49   : > { %v2502_v40 = vmul.f32 %v2498_v36, %v2470_v35  ;;  %v2503_v43 = vpack.c.bf16 %v2501_v38, %v2499_v41 }
 0xa4b   : > { %v2504_v42 = vpack.c.bf16 %v2502_v40, %v2500_v39 }
 0xa4d   : > { %2672 = vmatprep.mubr.bf16.mxu0 %v2504_v42 }
 0xa4e   : > { %2673 = vmatmul.mubr.bf16.vlgmr.msra.gmra.mxu0 %v2503_v43 }
 0xb0e   : > { %v3371_v44 = vpop.f32.mrf.mxu0 }
 0xb10   : > { %v3372_v46 = vpop.f32.mrf.mxu0 }
 0xb11   : > { %v3373_v47 = vadd.f32 %v3372_v46, %v3371_v44 }
 0xb12   : > { %v3374_v48 = vpop.f32.mrf.mxu0 }
 0xb13   : > { %v2675_v49 = vadd.f32 %v3373_v47, %v3272_v45 }
 0xb14   : > { %v3375_v19 = vpop.f32.mrf.mxu0 }
 0xb15   : > { %v2681_v50 = vadd.f32 %v2675_v49, %v4984_v57  ;;  %v3376_v51 = vadd.f32 %v3375_v19, %v3374_v48 }
 0xb17   : > { %2683 = vst.msk [vmem:[#allocation2] sm:$0xff] %vm1278_vm1, %v2681_v50  ;;  %v2678_v52 = vadd.f32 %v3376_v51, %v3272_v45  ;;  %2688 = sbr.rel (%p3289_p5) target bundleno = 3522 (0xdc2), region = 176 }
 0xb19   : > { %v2682_v53 = vadd.f32 %v2678_v52, %v4989_v62 }
 0xb1b   : > { %2684 = vst.msk [vmem:[#allocation2 + $0x8] sm:$0xff] %vm1278_vm1, %v2682_v53 }
 0xb1c   : > { %vm2691_vm9 = vcmask 516096   ;;  %v3769_v62 = vld [vmem:[%s5249_s13 + $0x18] sm:$0xff]   ;;  %v4287_v60 = vmov 0.0   ;;  %vm4288_vm10 = vmmov 0   ;;  %v3770_v61 = vld [vmem:[%s5249_s13 + $0x10] sm:$0xff]   ;;  %v3771_v63 = vld [vmem:[%s5249_s13 + $0x8] sm:$0xff]  }
 0xb1d   : > { %v2692_v54 = vsel %vm2691_vm9, %v2681_v50, 0.0  ;;  %3478 = vmatprep.subr.bf16.mxu0 %v4287_v60  ;;  %3486 = vmatprep.mubr.msk.bf16.mxu0 %vm4288_vm10, %v4287_v60  ;;  %v3772_v0 = vld [vmem:[%s5249_s13] sm:$0xff]   ;;  %v2690_v4 = vld [vmem:[#allocation27] sm:$0x1]  ;;  %v2798_v30 = vld [vmem:[#allocation7] sm:$0x1] }
 0xb1e   : > { %2693 = vadd.xlane.f32.xlu0 %v2692_v54  ;;  %3479 = vmatpush3.bf16.msra.mxu0 %v3769_v62  ;;  %v2689_v6 = vld [vmem:[%s5250_s12] sm:$0x1]  ;;  %vm2800_vm11 = vcmask 0  }
 0xb1f   : > { %3480 = vmatprep.subr.bf16.mxu0 %v4287_v60  ;;  %v2716_v11 = vld [vmem:[%s5251_s0] sm:$0x1] }
 0xb20   : > { %v2793_v26 = vld [vmem:[%s5252_s8] sm:$0x1] }
 0xb22   : > { %3481 = vmatpush3.bf16.msra.mxu0 %v3770_v61 }
 0xb23   : > { %3482 = vmatprep.subr.bf16.mxu0 %v4287_v60 }
 0xb26   : > { %3483 = vmatpush3.bf16.msra.mxu0 %v3771_v63 }
 0xb27   : > { %3484 = vmatprep.subr.bf16.mxu0 %v4287_v60 }
 0xb2a   : > { %3485 = vmatpush3.bf16.msra.mxu0 %v3772_v0 }
 0xba7   : > { %v2694_v55 = vpop.xlane.xlu0 %2693 }
 0xba8   : > { %v2695_v56 = vmul.f32 0.015625, %v2694_v55 }
 0xbaa   : > { %v2696_v58 = vsub.f32 %v2681_v50, %v2695_v56 }
 0xbac   : > { %v2697_v59 = vmul.f32 %v2696_v58, %v2696_v58 }
 0xbae   : > { %v2698_v57 = vsel %vm2691_vm9, %v2697_v59, 0.0 }
 0xbaf   : > { %2699 = vadd.xlane.f32.xlu0 %v2698_v57 }
 0xc38   : > { %v2700_v3 = vpop.xlane.xlu0 %2699 }
 0xc39   : > { %v2701_v1 = vmul.f32 0.015625, %v2700_v3 }
 0xc3b   : > { %v2702_v2 = vadd.f32 1e-05, %v2701_v1 }
 0xc3d   : > { %3773 = vrsqrt.f32 %v2702_v2 }
 0xc4a   : > { %v3774_v5 = vpop.eup %3773 }
 0xc4b   : > { %v2704_v7 = vmul.f32 %v3774_v5, %v2696_v58 }
 0xc4d   : > { %v2705_v8 = vmul.f32 %v2704_v7, %v2689_v6 }
 0xc4f   : > { %v2706_v9 = vadd.f32 %v2705_v8, %v2690_v4 }
 0xc51   : > { %v2707_v10 = vpack.c.bf16 %v2706_v9, %v2706_v9 }
 0xc53   : > { %3487 = vmatmul.mubr.msk.bf16.vlgmr.msra.gmra.mxu0 %vm1278_vm1, %v2707_v10 }
 0xd13   : > { %v2778_v12 = vpop.f32.mrf.mxu0 }
 0xd14   : > { %v2779_v13 = vadd.f32 %v2778_v12, %v2716_v11 }
 0xd15   : > { %v3488_v14 = vpop.f32.mrf.mxu0 }
 0xd16   : > { %v2785_v15 = vmul.f32 0.044715, %v2779_v13  ;;  %v2784_v24 = vmul.f32 0.5, %v2779_v13 }
 0xd17   : > { %v2781_v16 = vpop.f32.mrf.mxu0 }
 0xd18   : > { %v2786_v17 = vmul.f32 %v2785_v15, %v2779_v13 }
 0xd19   : > { %v3489_v18 = vpop.f32.mrf.mxu0 }
 0xd1a   : > { %v2787_v20 = vmul.f32 %v2786_v17, %v2779_v13 }
 0xd1c   : > { %v2788_v21 = vadd.f32 %v2787_v20, %v2779_v13 }
 0xd1e   : > { %v2789_v22 = vmul.f32 0.7978846, %v2788_v21 }
 0xd20   : > { %3775 = vtanh.f32 %v2789_v22 }
 0xd2d   : > { %v3776_v23 = vpop.eup %3775 }
 0xd2e   : > { %v2791_v25 = vadd.f32 1.0, %v3776_v23 }
 0xd30   : > { %v2792_v27 = vmul.f32 %v2791_v25, %v2784_v24 }
 0xd32   : > { %v2794_v28 = vmul.f32 %v2793_v26, %v2792_v27 }
 0xd34   : > { %v2795_v29 = vsel %vm2691_vm9, %v2794_v28, 0.0 }
 0xd35   : > { %2796 = vadd.xlane.f32.xlu1 %v2795_v29 }
 0xdbe   : > { %v2797_v31 = vpop.xlane.xlu1 %2796 }
 0xdbf   : > { %v2799_v32 = vadd.f32 %v2798_v30, %v2797_v31 }
 0xdc1   : > { %2801 = vst.msk [vmem:[%s1262_s29] sm:$0x1] %vm2800_vm11, %v2799_v32 }
 0xdc2 PF: > { %s5254_s5 = sld [smem:[#allocation44_spill]]  ;;  %s5264_s0 = smov %s4253_s30 }
 0xdc3   : > { %s5255_s27 = sld [smem:[#allocation37_spill]] }
 0xdc4   : > { %s5256_s28 = sld [smem:[#allocation38_spill]] }
 0xdc5   : > { %s5257_s23 = sld [smem:[#allocation50_spill]] }
 0xdc6   : > { %s5258_s6 = sld [smem:[#allocation39_spill]] }
 0xdc7   : > { %s5259_s2 = sld [smem:[#allocation40_spill]] }
 0xdc8   : > { %s57_s25 = sadd.s32 1, %s5254_s5   ;;  %s5260_s29 = sld [smem:[#allocation51_spill]] }
 0xdc9   : > { %p54_p0 = scmp.ge.s32.totalorder %s57_s25, 6   ;;  %s5261_s7 = sld [smem:[#allocation43_spill]] }
 0xdca   : > { %s5262_s1 = sld [smem:[#allocation48_spill]] }
 0xdcb   : > { %s5263_s3 = sld [smem:[#allocation49_spill]] }
 0xdcc   :  { %56 = sbr.rel (!%p54_p0) target bundleno = 44 (0x2c), region = 319 }
 0xdd0   : > { %s5265_s30 = smov %s5262_s1 }
 0xdd1   :  { %2819 = vsyncpa [#allocation9], 1 }
 0xdd2   :  { %2821 = vsyncpa [#allocation9 + $0x1], 1 }
 0xdd3   :  { %2822 = vsyncpa [#allocation11], 1 }
 0xdd4   :  { %2824 = vsyncpa [#allocation11 + $0x1], 1 }
 0xdd5   :  { %2825 = vsyncpa [#allocation14], 1 }
 0xdd6   :  { %2827 = vsyncpa [#allocation14 + $0x1], 1 }
 0xdd7   :  { %2828 = vsyncpa [#allocation17], 1 }
 0xdd8   :  { %2830 = vsyncpa [#allocation17 + $0x1], 1 }
 0xdd9   :  { %2831 = vsyncpa [#allocation20], 1 }
 0xdda   :  { %2833 = vsyncpa [#allocation20 + $0x1], 1 }
 0xddb   :  { %2834 = vsyncpa [#allocation23], 1 }
 0xddc   :  { %2836 = vsyncpa [#allocation23 + $0x1], 1 }
 0xddd   :  { %2837 = vsyncpa [#allocation26], 1 }
 0xdde   :  { %2839 = vsyncpa [#allocation26 + $0x1], 1 }

</bundles_post_ra>
